<compile_context>
chip_gen: v7x
topology: tpu7x:2x2x1
jax: 0.10.0
libtpu: 0.0.40
codegen_flags: <defaults>
</compile_context>

<pallas_src>
from functools import partial

import jax
import jax.numpy as jnp
from jax.experimental import pallas as pl
from jax.experimental.pallas import tpu as pltpu

LANE = 128    # TPU lane width; each gate (r, z, n) gets its own 128-lane slab.
CHUNK = 8     # GRU timesteps per grid iteration (one (8,128) output tile).


# --------------------------------------------------------------------------
# Kernel: CHUNK GRU steps per grid iteration, hidden state carried in VMEM.
# --------------------------------------------------------------------------
def gru_chunk_kernel(ig_ref, h0_ref, whh_ref, bhh_ref, out_ref, h_state, *, chunk):
    """Grid = (T_pad // chunk,).  Per grid step c:

    ig_ref  : (chunk, 384)  precomputed input gates for this chunk,
                            lane slabs [i_r | i_z | i_n] (pads are zero)
    h0_ref  : (1, 128)      lane-padded initial hidden state (resident)
    whh_ref : (128, 384)    W_hh^T packed into slabs [h_r | h_z | h_n] (resident)
    bhh_ref : (1, 384)      b_hh in the same slab layout (resident)
    out_ref : (chunk, 128)  hidden rows for this chunk (dense (8,128) tile)
    h_state : (1, 128)      VMEM scratch carrying h across grid steps
    """
    L = LANE
    c = pl.program_id(0)

    @pl.when(c == 0)
    def _():
        h_state[...] = h0_ref[...]

    whh = whh_ref[...]          # (128, 384), resident for the whole sequence
    bhh = bhh_ref[...]          # (1, 384)
    h = h_state[...]            # (1, 128)

    # Static Python unroll: chunk is small (8) and all indices stay static,
    # so every slice / row store is compile-time aligned (no dynamic stores).
    for i in range(chunk):
        xg = ig_ref[i:i + 1, :]                                  # (1, 384)
        hg = jnp.dot(h, whh, preferred_element_type=jnp.float32) + bhh  # (1, 384)

        r = jax.nn.sigmoid(xg[:, 0 * L:1 * L] + hg[:, 0 * L:1 * L])
        z = jax.nn.sigmoid(xg[:, 1 * L:2 * L] + hg[:, 1 * L:2 * L])
        n = jnp.tanh(xg[:, 2 * L:3 * L] + r * hg[:, 2 * L:3 * L])
        h = (1.0 - z) * n + z * h                                # (1, 128)

        out_ref[i:i + 1, :] = h.astype(out_ref.dtype)

    h_state[...] = h


def _gru_sequence_pallas(i_gates_pad, h0_pad, w_hh_pad, b_hh_pad):
    T_pad = i_gates_pad.shape[0]
    L = LANE
    n_chunks = T_pad // CHUNK
    return pl.pallas_call(
        partial(gru_chunk_kernel, chunk=CHUNK),
        out_shape=jax.ShapeDtypeStruct((T_pad, L), jnp.float32),
        grid_spec=pltpu.PrefetchScalarGridSpec(
            num_scalar_prefetch=0,
            grid=(n_chunks,),
            in_specs=[
                # per-chunk precomputed input gates (pipelined, Buffered(2) default)
                pl.BlockSpec((CHUNK, 3 * L), lambda c: (c, 0)),
                # resident operands (constant index_map -> DMA'd once)
                pl.BlockSpec((1, L), lambda c: (0, 0)),           # h0
                pl.BlockSpec((L, 3 * L), lambda c: (0, 0)),       # W_hh^T slabs
                pl.BlockSpec((1, 3 * L), lambda c: (0, 0)),       # b_hh slabs
            ],
            out_specs=pl.BlockSpec((CHUNK, L), lambda c: (c, 0)),
            scratch_shapes=[pltpu.VMEM((1, L), jnp.float32)],     # hidden carry
        ),
        compiler_params=pltpu.CompilerParams(
            # hidden-state carry across chunks -> sequential grid axis
            dimension_semantics=("arbitrary",),
        ),
    )(i_gates_pad, h0_pad, w_hh_pad, b_hh_pad)


# --------------------------------------------------------------------------
# Parameter construction / packing (done once, like module init).
# --------------------------------------------------------------------------
def init_encoder_params(key, input_size, hidden_size):
    """Synthetic parameters in PyTorch layout (nn.Embedding + nn.GRU layer 0)."""
    k_emb, k_wih, k_whh, k_bih, k_bhh = jax.random.split(key, 5)
    bound = 1.0 / jnp.sqrt(jnp.float32(hidden_size))
    return {
        "embedding": jax.random.normal(k_emb, (input_size, hidden_size), jnp.float32),
        "w_ih": jax.random.uniform(k_wih, (3 * hidden_size, hidden_size),
                                   jnp.float32, -bound, bound),
        "w_hh": jax.random.uniform(k_whh, (3 * hidden_size, hidden_size),
                                   jnp.float32, -bound, bound),
        "b_ih": jax.random.uniform(k_bih, (3 * hidden_size,), jnp.float32, -bound, bound),
        "b_hh": jax.random.uniform(k_bhh, (3 * hidden_size,), jnp.float32, -bound, bound),
    }


def pack_encoder_params(raw, hidden_size):
    """Pack PyTorch-layout params into the lane-aligned kernel layout.

    Gate order is PyTorch's (r, z, n).  Every gate gets a 128-lane slab; all
    pad rows / columns / bias lanes are exactly zero (pad-lane invariant).
    """
    H = hidden_size
    L = LANE
    assert H <= L, "this packing assumes hidden_size <= 128 (one lane slab per gate)"

    w_ih_pad = jnp.zeros((H, 3 * L), jnp.float32)     # (H, 384): x-side, used by XLA GEMM
    b_ih_pad = jnp.zeros((1, 3 * L), jnp.float32)
    w_hh_pad = jnp.zeros((L, 3 * L), jnp.float32)     # (128, 384): h-side, resident in kernel
    b_hh_pad = jnp.zeros((1, 3 * L), jnp.float32)
    for g in range(3):  # r, z, n
        w_ih_pad = w_ih_pad.at[:, g * L:g * L + H].set(raw["w_ih"][g * H:(g + 1) * H, :].T)
        b_ih_pad = b_ih_pad.at[0, g * L:g * L + H].set(raw["b_ih"][g * H:(g + 1) * H])
        w_hh_pad = w_hh_pad.at[0:H, g * L:g * L + H].set(raw["w_hh"][g * H:(g + 1) * H, :].T)
        b_hh_pad = b_hh_pad.at[0, g * L:g * L + H].set(raw["b_hh"][g * H:(g + 1) * H])

    return {
        "embedding": raw["embedding"],   # (V, H) — gathered outside the kernel
        "w_ih_pad": w_ih_pad,
        "b_ih_pad": b_ih_pad,
        "w_hh_pad": w_hh_pad,
        "b_hh_pad": b_hh_pad,
    }


# --------------------------------------------------------------------------
# Public forward wrappers.
# --------------------------------------------------------------------------
@partial(jax.jit, static_argnames=("hidden_size",))
def encode_sequence(packed, tokens, hidden0, *, hidden_size):
    """Run the encoder over a whole token sequence.

    tokens : (T,) int32, hidden0 : (1, 1, H).
    Returns (outputs (T, 1, H), hidden (1, 1, H)) — identical to applying
    Encoder.forward token-by-token and collecting outputs / final hidden.
    """
    H = hidden_size
    L = LANE
    T = tokens.shape[0]
    tokens = tokens.astype(jnp.int32)

    # Pad the sequence to a multiple of CHUNK; the extra steps are computed
    # but their outputs are discarded (they never feed back into [:T]).
    T_pad = pl.cdiv(T, CHUNK) * CHUNK
    tok_pad = jnp.pad(tokens, (0, T_pad - T))

    # Hoisted input-side matmul: one MXU-friendly (T_pad, H) @ (H, 384) GEMM
    # + embedding gather, all outside the sequential recurrence.
    emb_rows = jnp.take(packed["embedding"], tok_pad, axis=0)            # (T_pad, H)
    i_gates = emb_rows @ packed["w_ih_pad"] + packed["b_ih_pad"]         # (T_pad, 384)

    h0_pad = jnp.zeros((1, L), jnp.float32).at[:, :H].set(hidden0.reshape(1, H))

    out = _gru_sequence_pallas(i_gates, h0_pad,
                               packed["w_hh_pad"], packed["b_hh_pad"])   # (T_pad, 128)
    hs = out[:T, :H]                          # (T, H)
    outputs = hs.reshape(T, 1, H)
    hidden_new = hs[-1].reshape(1, 1, H)
    return outputs, hidden_new


def encoder_forward(packed, token, hidden, *, hidden_size):
    """Exactly Encoder.forward(input, hidden): one token, returns (output, hidden)."""
    tokens = jnp.reshape(jnp.asarray(token, jnp.int32), (1,))
    outputs, hidden_new = encode_sequence(packed, tokens, hidden, hidden_size=hidden_size)
    return outputs[0].reshape(1, 1, hidden_size), hidden_new


# --------------------------------------------------------------------------
# Pure-JAX reference (PyTorch nn.GRU semantics) for correctness checking.
# --------------------------------------------------------------------------
def _gru_reference_seq(raw, tokens, hidden0):
    H = hidden0.shape[-1]
    h = hidden0.reshape(1, H)
    outs = []
    for tok in list(tokens):
        x = raw["embedding"][tok].reshape(1, H)
        gi = x @ raw["w_ih"].T + raw["b_ih"]
        gh = h @ raw["w_hh"].T + raw["b_hh"]
        i_r, i_z, i_n = gi[:, :H], gi[:, H:2 * H], gi[:, 2 * H:]
        h_r, h_z, h_n = gh[:, :H], gh[:, H:2 * H], gh[:, 2 * H:]
        r = jax.nn.sigmoid(i_r + h_r)
        z = jax.nn.sigmoid(i_z + h_z)
        n = jnp.tanh(i_n + r * h_n)
        h = (1.0 - z) * n + z * h
        outs.append(h)
    return jnp.stack(outs, axis=0), h        # (T, 1, H), (1, H)


if __name__ == "__main__":
    input_size = 10      # vocab size
    hidden_size = 32
    seq_len = 8

    key = jax.random.PRNGKey(0)
    raw = init_encoder_params(key, input_size, hidden_size)
    packed = pack_encoder_params(raw, hidden_size)

    tokens = jax.random.randint(jax.random.PRNGKey(1), (seq_len,), 0, input_size,
                                dtype=jnp.int32)
    hidden0 = jnp.zeros((1, 1, hidden_size), jnp.float32)   # Encoder.initHidden()

    # ---- whole-sequence path: ONE pallas_call for all seq_len GRU steps ----
    outputs, hidden_T = encode_sequence(packed, tokens, hidden0, hidden_size=hidden_size)
    outputs = jax.block_until_ready(outputs)
    hidden_T = jax.block_until_ready(hidden_T)

    ref_outputs, ref_hidden = _gru_reference_seq(raw, tokens, hidden0)
    assert outputs.shape == (seq_len, 1, hidden_size)
    assert hidden_T.shape == (1, 1, hidden_size)
    assert jnp.allclose(outputs, ref_outputs, atol=1e-4, rtol=1e-4), \
        "sequence outputs mismatch vs pure-JAX reference"
    assert jnp.allclose(hidden_T, ref_hidden.reshape(1, 1, hidden_size),
                        atol=1e-4, rtol=1e-4), \
        "final hidden mismatch vs pure-JAX reference"

    # ---- single-step path: exactly the PyTorch module's forward() ----------
    out1, hid1 = encoder_forward(packed, tokens[0], hidden0, hidden_size=hidden_size)
    out1 = jax.block_until_ready(out1)
    hid1 = jax.block_until_ready(hid1)
    assert out1.shape == (1, 1, hidden_size) and hid1.shape == (1, 1, hidden_size)
    assert jnp.allclose(out1, ref_outputs[0].reshape(1, 1, hidden_size),
                        atol=1e-4, rtol=1e-4), "single-step output mismatch"
    # valid because GRU output row == hidden state for a single-layer GRU
    assert jnp.allclose(hid1, ref_outputs[0].reshape(1, 1, hidden_size),
                        atol=1e-4, rtol=1e-4), "single-step hidden mismatch"

    print("KERNEL_OK")
</pallas_src>

<mosaic_0001>
module attributes {stable_mosaic.version = 11 : i64} {
  func.func @gru_chunk_kernel(%arg0: i32, %arg1: memref<8x384xf32, #tpu.memory_space<vmem>>, %arg2: memref<1x128xf32, #tpu.memory_space<vmem>>, %arg3: memref<128x384xf32, #tpu.memory_space<vmem>>, %arg4: memref<1x384xf32, #tpu.memory_space<vmem>>, %arg5: memref<8x128xf32, #tpu.memory_space<vmem>>, %arg6: memref<1x128xf32, #tpu.memory_space<vmem>>) attributes {dimension_semantics = [#tpu.dimension_semantics<arbitrary>], iteration_bounds = array<i64: 1>, scalar_prefetch = 0 : i64, scratch_operands = 1 : i64, tpu.core_type = #tpu.core_type<tc>, window_params = [{transform_indices = @transform_0, window_bounds = array<i64: 8, 384>}, {pipeline_mode = #tpu.pipeline_mode<synchronous>, transform_indices = @transform_1, window_bounds = array<i64: 1, 128>}, {pipeline_mode = #tpu.pipeline_mode<synchronous>, transform_indices = @transform_2, window_bounds = array<i64: 128, 384>}, {pipeline_mode = #tpu.pipeline_mode<synchronous>, transform_indices = @transform_3, window_bounds = array<i64: 1, 384>}, {transform_indices = @transform_4, window_bounds = array<i64: 8, 128>}]} {
    %c0_i32 = arith.constant 0 : i32
    %0 = arith.cmpi eq, %arg0, %c0_i32 : i32
    %1 = arith.extui %0 : i1 to i32
    %c0_i32_0 = arith.constant 0 : i32
    %2 = arith.cmpi ne, %1, %c0_i32_0 : i32
    scf.if %2 {
      %c0_64 = arith.constant 0 : index
      %c0_65 = arith.constant 0 : index
      %247 = vector.load %arg2[%c0_64, %c0_65] : memref<1x128xf32, #tpu.memory_space<vmem>>, vector<1x128xf32>
      %c0_66 = arith.constant 0 : index
      %c0_67 = arith.constant 0 : index
      %248 = vector.load %arg6[%c0_66, %c0_67] : memref<1x128xf32, #tpu.memory_space<vmem>>, vector<1x128xf32>
      tpu.vector_store %arg6[%c0_66, %c0_67], %247 {strides = array<i32>} : memref<1x128xf32, #tpu.memory_space<vmem>>, vector<1x128xf32>,
    } else {
    }
    %c0 = arith.constant 0 : index
    %c0_1 = arith.constant 0 : index
    %3 = vector.load %arg3[%c0, %c0_1] : memref<128x384xf32, #tpu.memory_space<vmem>>, vector<128x384xf32>
    %c0_2 = arith.constant 0 : index
    %c0_3 = arith.constant 0 : index
    %4 = vector.load %arg4[%c0_2, %c0_3] : memref<1x384xf32, #tpu.memory_space<vmem>>, vector<1x384xf32>
    %c0_4 = arith.constant 0 : index
    %c0_5 = arith.constant 0 : index
    %5 = vector.load %arg6[%c0_4, %c0_5] : memref<1x128xf32, #tpu.memory_space<vmem>>, vector<1x128xf32>
    %c0_6 = arith.constant 0 : index
    %c0_7 = arith.constant 0 : index
    %6 = vector.load %arg1[%c0_6, %c0_7] : memref<8x384xf32, #tpu.memory_space<vmem>>, vector<1x384xf32>
    %cst = arith.constant dense<0.000000e+00> : vector<1x384xf32>
    %7 = tpu.matmul %5, %3, %cst {dimension_numbers = #tpu.dot_dimension_numbers<[1], [0], [0], [1], [0, 0, 1, 1], [], []>} : vector<1x128xf32>, vector<128x384xf32>, vector<1x384xf32> -> vector<1x384xf32>
    %8 = arith.addf %7, %4 : vector<1x384xf32>
    %9 = vector.extract_strided_slice %6 {offsets = [0, 0], sizes = [1, 128], strides = [1, 1]} : vector<1x384xf32> to vector<1x128xf32>
    %10 = vector.extract_strided_slice %8 {offsets = [0, 0], sizes = [1, 128], strides = [1, 1]} : vector<1x384xf32> to vector<1x128xf32>
    %11 = arith.addf %9, %10 : vector<1x128xf32>
    %12 = arith.negf %11 : vector<1x128xf32>
    %13 = math.exp %12 : vector<1x128xf32>
    %cst_8 = arith.constant 1.000000e+00 : f32
    %14 = vector.broadcast %cst_8 : f32 to vector<1x128xf32>
    %15 = arith.addf %14, %13 : vector<1x128xf32>
    %16 = arith.divf %14, %15 : vector<1x128xf32>
    %17 = vector.extract_strided_slice %6 {offsets = [0, 128], sizes = [1, 128], strides = [1, 1]} : vector<1x384xf32> to vector<1x128xf32>
    %18 = vector.extract_strided_slice %8 {offsets = [0, 128], sizes = [1, 128], strides = [1, 1]} : vector<1x384xf32> to vector<1x128xf32>
    %19 = arith.addf %17, %18 : vector<1x128xf32>
    %20 = arith.negf %19 : vector<1x128xf32>
    %21 = math.exp %20 : vector<1x128xf32>
    %cst_9 = arith.constant 1.000000e+00 : f32
    %22 = vector.broadcast %cst_9 : f32 to vector<1x128xf32>
    %23 = arith.addf %22, %21 : vector<1x128xf32>
    %24 = arith.divf %22, %23 : vector<1x128xf32>
    %25 = vector.extract_strided_slice %6 {offsets = [0, 256], sizes = [1, 128], strides = [1, 1]} : vector<1x384xf32> to vector<1x128xf32>
    %26 = vector.extract_strided_slice %8 {offsets = [0, 256], sizes = [1, 128], strides = [1, 1]} : vector<1x384xf32> to vector<1x128xf32>
    %27 = arith.mulf %16, %26 : vector<1x128xf32>
    %28 = arith.addf %25, %27 : vector<1x128xf32>
    %29 = math.tanh %28 : vector<1x128xf32>
    %cst_10 = arith.constant 1.000000e+00 : f32
    %30 = vector.broadcast %cst_10 : f32 to vector<1x128xf32>
    %31 = arith.subf %30, %24 : vector<1x128xf32>
    %32 = arith.mulf %31, %29 : vector<1x128xf32>
    %33 = arith.mulf %24, %5 : vector<1x128xf32>
    %34 = arith.addf %32, %33 : vector<1x128xf32>
    %c0_11 = arith.constant 0 : index
    %c0_12 = arith.constant 0 : index
    %35 = vector.load %arg5[%c0_11, %c0_12] : memref<8x128xf32, #tpu.memory_space<vmem>>, vector<1x128xf32>
    tpu.vector_store %arg5[%c0_11, %c0_12], %34 {strides = array<i32>} : memref<8x128xf32, #tpu.memory_space<vmem>>, vector<1x128xf32>,
    %c1 = arith.constant 1 : index
    %c0_13 = arith.constant 0 : index
    %36 = vector.load %arg1[%c1, %c0_13] : memref<8x384xf32, #tpu.memory_space<vmem>>, vector<1x384xf32>
    %cst_14 = arith.constant dense<0.000000e+00> : vector<1x384xf32>
    %37 = tpu.matmul %34, %3, %cst_14 {dimension_numbers = #tpu.dot_dimension_numbers<[1], [0], [0], [1], [0, 0, 1, 1], [], []>} : vector<1x128xf32>, vector<128x384xf32>, vector<1x384xf32> -> vector<1x384xf32>
    %38 = arith.addf %37, %4 : vector<1x384xf32>
    %39 = vector.extract_strided_slice %36 {offsets = [0, 0], sizes = [1, 128], strides = [1, 1]} : vector<1x384xf32> to vector<1x128xf32>
    %40 = vector.extract_strided_slice %38 {offsets = [0, 0], sizes = [1, 128], strides = [1, 1]} : vector<1x384xf32> to vector<1x128xf32>
    %41 = arith.addf %39, %40 : vector<1x128xf32>
    %42 = arith.negf %41 : vector<1x128xf32>
    %43 = math.exp %42 : vector<1x128xf32>
    %cst_15 = arith.constant 1.000000e+00 : f32
    %44 = vector.broadcast %cst_15 : f32 to vector<1x128xf32>
    %45 = arith.addf %44, %43 : vector<1x128xf32>
    %46 = arith.divf %44, %45 : vector<1x128xf32>
    %47 = vector.extract_strided_slice %36 {offsets = [0, 128], sizes = [1, 128], strides = [1, 1]} : vector<1x384xf32> to vector<1x128xf32>
    %48 = vector.extract_strided_slice %38 {offsets = [0, 128], sizes = [1, 128], strides = [1, 1]} : vector<1x384xf32> to vector<1x128xf32>
    %49 = arith.addf %47, %48 : vector<1x128xf32>
    %50 = arith.negf %49 : vector<1x128xf32>
    %51 = math.exp %50 : vector<1x128xf32>
    %cst_16 = arith.constant 1.000000e+00 : f32
    %52 = vector.broadcast %cst_16 : f32 to vector<1x128xf32>
    %53 = arith.addf %52, %51 : vector<1x128xf32>
    %54 = arith.divf %52, %53 : vector<1x128xf32>
    %55 = vector.extract_strided_slice %36 {offsets = [0, 256], sizes = [1, 128], strides = [1, 1]} : vector<1x384xf32> to vector<1x128xf32>
    %56 = vector.extract_strided_slice %38 {offsets = [0, 256], sizes = [1, 128], strides = [1, 1]} : vector<1x384xf32> to vector<1x128xf32>
    %57 = arith.mulf %46, %56 : vector<1x128xf32>
    %58 = arith.addf %55, %57 : vector<1x128xf32>
    %59 = math.tanh %58 : vector<1x128xf32>
    %cst_17 = arith.constant 1.000000e+00 : f32
    %60 = vector.broadcast %cst_17 : f32 to vector<1x128xf32>
    %61 = arith.subf %60, %54 : vector<1x128xf32>
    %62 = arith.mulf %61, %59 : vector<1x128xf32>
    %63 = arith.mulf %54, %34 : vector<1x128xf32>
    %64 = arith.addf %62, %63 : vector<1x128xf32>
    %c1_18 = arith.constant 1 : index
    %c0_19 = arith.constant 0 : index
    %65 = vector.load %arg5[%c1_18, %c0_19] : memref<8x128xf32, #tpu.memory_space<vmem>>, vector<1x128xf32>
    tpu.vector_store %arg5[%c1_18, %c0_19], %64 {strides = array<i32>} : memref<8x128xf32, #tpu.memory_space<vmem>>, vector<1x128xf32>,
    %c2 = arith.constant 2 : index
    %c0_20 = arith.constant 0 : index
    %66 = vector.load %arg1[%c2, %c0_20] : memref<8x384xf32, #tpu.memory_space<vmem>>, vector<1x384xf32>
    %cst_21 = arith.constant dense<0.000000e+00> : vector<1x384xf32>
    %67 = tpu.matmul %64, %3, %cst_21 {dimension_numbers = #tpu.dot_dimension_numbers<[1], [0], [0], [1], [0, 0, 1, 1], [], []>} : vector<1x128xf32>, vector<128x384xf32>, vector<1x384xf32> -> vector<1x384xf32>
    %68 = arith.addf %67, %4 : vector<1x384xf32>
    %69 = vector.extract_strided_slice %66 {offsets = [0, 0], sizes = [1, 128], strides = [1, 1]} : vector<1x384xf32> to vector<1x128xf32>
    %70 = vector.extract_strided_slice %68 {offsets = [0, 0], sizes = [1, 128], strides = [1, 1]} : vector<1x384xf32> to vector<1x128xf32>
    %71 = arith.addf %69, %70 : vector<1x128xf32>
    %72 = arith.negf %71 : vector<1x128xf32>
    %73 = math.exp %72 : vector<1x128xf32>
    %cst_22 = arith.constant 1.000000e+00 : f32
    %74 = vector.broadcast %cst_22 : f32 to vector<1x128xf32>
    %75 = arith.addf %74, %73 : vector<1x128xf32>
    %76 = arith.divf %74, %75 : vector<1x128xf32>
    %77 = vector.extract_strided_slice %66 {offsets = [0, 128], sizes = [1, 128], strides = [1, 1]} : vector<1x384xf32> to vector<1x128xf32>
    %78 = vector.extract_strided_slice %68 {offsets = [0, 128], sizes = [1, 128], strides = [1, 1]} : vector<1x384xf32> to vector<1x128xf32>
    %79 = arith.addf %77, %78 : vector<1x128xf32>
    %80 = arith.negf %79 : vector<1x128xf32>
    %81 = math.exp %80 : vector<1x128xf32>
    %cst_23 = arith.constant 1.000000e+00 : f32
    %82 = vector.broadcast %cst_23 : f32 to vector<1x128xf32>
    %83 = arith.addf %82, %81 : vector<1x128xf32>
    %84 = arith.divf %82, %83 : vector<1x128xf32>
    %85 = vector.extract_strided_slice %66 {offsets = [0, 256], sizes = [1, 128], strides = [1, 1]} : vector<1x384xf32> to vector<1x128xf32>
    %86 = vector.extract_strided_slice %68 {offsets = [0, 256], sizes = [1, 128], strides = [1, 1]} : vector<1x384xf32> to vector<1x128xf32>
    %87 = arith.mulf %76, %86 : vector<1x128xf32>
    %88 = arith.addf %85, %87 : vector<1x128xf32>
    %89 = math.tanh %88 : vector<1x128xf32>
    %cst_24 = arith.constant 1.000000e+00 : f32
    %90 = vector.broadcast %cst_24 : f32 to vector<1x128xf32>
    %91 = arith.subf %90, %84 : vector<1x128xf32>
    %92 = arith.mulf %91, %89 : vector<1x128xf32>
    %93 = arith.mulf %84, %64 : vector<1x128xf32>
    %94 = arith.addf %92, %93 : vector<1x128xf32>
    %c2_25 = arith.constant 2 : index
    %c0_26 = arith.constant 0 : index
    %95 = vector.load %arg5[%c2_25, %c0_26] : memref<8x128xf32, #tpu.memory_space<vmem>>, vector<1x128xf32>
    tpu.vector_store %arg5[%c2_25, %c0_26], %94 {strides = array<i32>} : memref<8x128xf32, #tpu.memory_space<vmem>>, vector<1x128xf32>,
    %c3 = arith.constant 3 : index
    %c0_27 = arith.constant 0 : index
    %96 = vector.load %arg1[%c3, %c0_27] : memref<8x384xf32, #tpu.memory_space<vmem>>, vector<1x384xf32>
    %cst_28 = arith.constant dense<0.000000e+00> : vector<1x384xf32>
    %97 = tpu.matmul %94, %3, %cst_28 {dimension_numbers = #tpu.dot_dimension_numbers<[1], [0], [0], [1], [0, 0, 1, 1], [], []>} : vector<1x128xf32>, vector<128x384xf32>, vector<1x384xf32> -> vector<1x384xf32>
    %98 = arith.addf %97, %4 : vector<1x384xf32>
    %99 = vector.extract_strided_slice %96 {offsets = [0, 0], sizes = [1, 128], strides = [1, 1]} : vector<1x384xf32> to vector<1x128xf32>
    %100 = vector.extract_strided_slice %98 {offsets = [0, 0], sizes = [1, 128], strides = [1, 1]} : vector<1x384xf32> to vector<1x128xf32>
    %101 = arith.addf %99, %100 : vector<1x128xf32>
    %102 = arith.negf %101 : vector<1x128xf32>
    %103 = math.exp %102 : vector<1x128xf32>
    %cst_29 = arith.constant 1.000000e+00 : f32
    %104 = vector.broadcast %cst_29 : f32 to vector<1x128xf32>
    %105 = arith.addf %104, %103 : vector<1x128xf32>
    %106 = arith.divf %104, %105 : vector<1x128xf32>
    %107 = vector.extract_strided_slice %96 {offsets = [0, 128], sizes = [1, 128], strides = [1, 1]} : vector<1x384xf32> to vector<1x128xf32>
    %108 = vector.extract_strided_slice %98 {offsets = [0, 128], sizes = [1, 128], strides = [1, 1]} : vector<1x384xf32> to vector<1x128xf32>
    %109 = arith.addf %107, %108 : vector<1x128xf32>
    %110 = arith.negf %109 : vector<1x128xf32>
    %111 = math.exp %110 : vector<1x128xf32>
    %cst_30 = arith.constant 1.000000e+00 : f32
    %112 = vector.broadcast %cst_30 : f32 to vector<1x128xf32>
    %113 = arith.addf %112, %111 : vector<1x128xf32>
    %114 = arith.divf %112, %113 : vector<1x128xf32>
    %115 = vector.extract_strided_slice %96 {offsets = [0, 256], sizes = [1, 128], strides = [1, 1]} : vector<1x384xf32> to vector<1x128xf32>
    %116 = vector.extract_strided_slice %98 {offsets = [0, 256], sizes = [1, 128], strides = [1, 1]} : vector<1x384xf32> to vector<1x128xf32>
    %117 = arith.mulf %106, %116 : vector<1x128xf32>
    %118 = arith.addf %115, %117 : vector<1x128xf32>
    %119 = math.tanh %118 : vector<1x128xf32>
    %cst_31 = arith.constant 1.000000e+00 : f32
    %120 = vector.broadcast %cst_31 : f32 to vector<1x128xf32>
    %121 = arith.subf %120, %114 : vector<1x128xf32>
    %122 = arith.mulf %121, %119 : vector<1x128xf32>
    %123 = arith.mulf %114, %94 : vector<1x128xf32>
    %124 = arith.addf %122, %123 : vector<1x128xf32>
    %c3_32 = arith.constant 3 : index
    %c0_33 = arith.constant 0 : index
    %125 = vector.load %arg5[%c3_32, %c0_33] : memref<8x128xf32, #tpu.memory_space<vmem>>, vector<1x128xf32>
    tpu.vector_store %arg5[%c3_32, %c0_33], %124 {strides = array<i32>} : memref<8x128xf32, #tpu.memory_space<vmem>>, vector<1x128xf32>,
    %c4 = arith.constant 4 : index
    %c0_34 = arith.constant 0 : index
    %126 = vector.load %arg1[%c4, %c0_34] : memref<8x384xf32, #tpu.memory_space<vmem>>, vector<1x384xf32>
    %cst_35 = arith.constant dense<0.000000e+00> : vector<1x384xf32>
    %127 = tpu.matmul %124, %3, %cst_35 {dimension_numbers = #tpu.dot_dimension_numbers<[1], [0], [0], [1], [0, 0, 1, 1], [], []>} : vector<1x128xf32>, vector<128x384xf32>, vector<1x384xf32> -> vector<1x384xf32>
    %128 = arith.addf %127, %4 : vector<1x384xf32>
    %129 = vector.extract_strided_slice %126 {offsets = [0, 0], sizes = [1, 128], strides = [1, 1]} : vector<1x384xf32> to vector<1x128xf32>
    %130 = vector.extract_strided_slice %128 {offsets = [0, 0], sizes = [1, 128], strides = [1, 1]} : vector<1x384xf32> to vector<1x128xf32>
    %131 = arith.addf %129, %130 : vector<1x128xf32>
    %132 = arith.negf %131 : vector<1x128xf32>
    %133 = math.exp %132 : vector<1x128xf32>
    %cst_36 = arith.constant 1.000000e+00 : f32
    %134 = vector.broadcast %cst_36 : f32 to vector<1x128xf32>
    %135 = arith.addf %134, %133 : vector<1x128xf32>
    %136 = arith.divf %134, %135 : vector<1x128xf32>
    %137 = vector.extract_strided_slice %126 {offsets = [0, 128], sizes = [1, 128], strides = [1, 1]} : vector<1x384xf32> to vector<1x128xf32>
    %138 = vector.extract_strided_slice %128 {offsets = [0, 128], sizes = [1, 128], strides = [1, 1]} : vector<1x384xf32> to vector<1x128xf32>
    %139 = arith.addf %137, %138 : vector<1x128xf32>
    %140 = arith.negf %139 : vector<1x128xf32>
    %141 = math.exp %140 : vector<1x128xf32>
    %cst_37 = arith.constant 1.000000e+00 : f32
    %142 = vector.broadcast %cst_37 : f32 to vector<1x128xf32>
    %143 = arith.addf %142, %141 : vector<1x128xf32>
    %144 = arith.divf %142, %143 : vector<1x128xf32>
    %145 = vector.extract_strided_slice %126 {offsets = [0, 256], sizes = [1, 128], strides = [1, 1]} : vector<1x384xf32> to vector<1x128xf32>
    %146 = vector.extract_strided_slice %128 {offsets = [0, 256], sizes = [1, 128], strides = [1, 1]} : vector<1x384xf32> to vector<1x128xf32>
    %147 = arith.mulf %136, %146 : vector<1x128xf32>
    %148 = arith.addf %145, %147 : vector<1x128xf32>
    %149 = math.tanh %148 : vector<1x128xf32>
    %cst_38 = arith.constant 1.000000e+00 : f32
    %150 = vector.broadcast %cst_38 : f32 to vector<1x128xf32>
    %151 = arith.subf %150, %144 : vector<1x128xf32>
    %152 = arith.mulf %151, %149 : vector<1x128xf32>
    %153 = arith.mulf %144, %124 : vector<1x128xf32>
    %154 = arith.addf %152, %153 : vector<1x128xf32>
    %c4_39 = arith.constant 4 : index
    %c0_40 = arith.constant 0 : index
    %155 = vector.load %arg5[%c4_39, %c0_40] : memref<8x128xf32, #tpu.memory_space<vmem>>, vector<1x128xf32>
    tpu.vector_store %arg5[%c4_39, %c0_40], %154 {strides = array<i32>} : memref<8x128xf32, #tpu.memory_space<vmem>>, vector<1x128xf32>,
    %c5 = arith.constant 5 : index
    %c0_41 = arith.constant 0 : index
    %156 = vector.load %arg1[%c5, %c0_41] : memref<8x384xf32, #tpu.memory_space<vmem>>, vector<1x384xf32>
    %cst_42 = arith.constant dense<0.000000e+00> : vector<1x384xf32>
    %157 = tpu.matmul %154, %3, %cst_42 {dimension_numbers = #tpu.dot_dimension_numbers<[1], [0], [0], [1], [0, 0, 1, 1], [], []>} : vector<1x128xf32>, vector<128x384xf32>, vector<1x384xf32> -> vector<1x384xf32>
    %158 = arith.addf %157, %4 : vector<1x384xf32>
    %159 = vector.extract_strided_slice %156 {offsets = [0, 0], sizes = [1, 128], strides = [1, 1]} : vector<1x384xf32> to vector<1x128xf32>
    %160 = vector.extract_strided_slice %158 {offsets = [0, 0], sizes = [1, 128], strides = [1, 1]} : vector<1x384xf32> to vector<1x128xf32>
    %161 = arith.addf %159, %160 : vector<1x128xf32>
    %162 = arith.negf %161 : vector<1x128xf32>
    %163 = math.exp %162 : vector<1x128xf32>
    %cst_43 = arith.constant 1.000000e+00 : f32
    %164 = vector.broadcast %cst_43 : f32 to vector<1x128xf32>
    %165 = arith.addf %164, %163 : vector<1x128xf32>
    %166 = arith.divf %164, %165 : vector<1x128xf32>
    %167 = vector.extract_strided_slice %156 {offsets = [0, 128], sizes = [1, 128], strides = [1, 1]} : vector<1x384xf32> to vector<1x128xf32>
    %168 = vector.extract_strided_slice %158 {offsets = [0, 128], sizes = [1, 128], strides = [1, 1]} : vector<1x384xf32> to vector<1x128xf32>
    %169 = arith.addf %167, %168 : vector<1x128xf32>
    %170 = arith.negf %169 : vector<1x128xf32>
    %171 = math.exp %170 : vector<1x128xf32>
    %cst_44 = arith.constant 1.000000e+00 : f32
    %172 = vector.broadcast %cst_44 : f32 to vector<1x128xf32>
    %173 = arith.addf %172, %171 : vector<1x128xf32>
    %174 = arith.divf %172, %173 : vector<1x128xf32>
    %175 = vector.extract_strided_slice %156 {offsets = [0, 256], sizes = [1, 128], strides = [1, 1]} : vector<1x384xf32> to vector<1x128xf32>
    %176 = vector.extract_strided_slice %158 {offsets = [0, 256], sizes = [1, 128], strides = [1, 1]} : vector<1x384xf32> to vector<1x128xf32>
    %177 = arith.mulf %166, %176 : vector<1x128xf32>
    %178 = arith.addf %175, %177 : vector<1x128xf32>
    %179 = math.tanh %178 : vector<1x128xf32>
    %cst_45 = arith.constant 1.000000e+00 : f32
    %180 = vector.broadcast %cst_45 : f32 to vector<1x128xf32>
    %181 = arith.subf %180, %174 : vector<1x128xf32>
    %182 = arith.mulf %181, %179 : vector<1x128xf32>
    %183 = arith.mulf %174, %154 : vector<1x128xf32>
    %184 = arith.addf %182, %183 : vector<1x128xf32>
    %c5_46 = arith.constant 5 : index
    %c0_47 = arith.constant 0 : index
    %185 = vector.load %arg5[%c5_46, %c0_47] : memref<8x128xf32, #tpu.memory_space<vmem>>, vector<1x128xf32>
    tpu.vector_store %arg5[%c5_46, %c0_47], %184 {strides = array<i32>} : memref<8x128xf32, #tpu.memory_space<vmem>>, vector<1x128xf32>,
    %c6 = arith.constant 6 : index
    %c0_48 = arith.constant 0 : index
    %186 = vector.load %arg1[%c6, %c0_48] : memref<8x384xf32, #tpu.memory_space<vmem>>, vector<1x384xf32>
    %cst_49 = arith.constant dense<0.000000e+00> : vector<1x384xf32>
    %187 = tpu.matmul %184, %3, %cst_49 {dimension_numbers = #tpu.dot_dimension_numbers<[1], [0], [0], [1], [0, 0, 1, 1], [], []>} : vector<1x128xf32>, vector<128x384xf32>, vector<1x384xf32> -> vector<1x384xf32>
    %188 = arith.addf %187, %4 : vector<1x384xf32>
    %189 = vector.extract_strided_slice %186 {offsets = [0, 0], sizes = [1, 128], strides = [1, 1]} : vector<1x384xf32> to vector<1x128xf32>
    %190 = vector.extract_strided_slice %188 {offsets = [0, 0], sizes = [1, 128], strides = [1, 1]} : vector<1x384xf32> to vector<1x128xf32>
    %191 = arith.addf %189, %190 : vector<1x128xf32>
    %192 = arith.negf %191 : vector<1x128xf32>
    %193 = math.exp %192 : vector<1x128xf32>
    %cst_50 = arith.constant 1.000000e+00 : f32
    %194 = vector.broadcast %cst_50 : f32 to vector<1x128xf32>
    %195 = arith.addf %194, %193 : vector<1x128xf32>
    %196 = arith.divf %194, %195 : vector<1x128xf32>
    %197 = vector.extract_strided_slice %186 {offsets = [0, 128], sizes = [1, 128], strides = [1, 1]} : vector<1x384xf32> to vector<1x128xf32>
    %198 = vector.extract_strided_slice %188 {offsets = [0, 128], sizes = [1, 128], strides = [1, 1]} : vector<1x384xf32> to vector<1x128xf32>
    %199 = arith.addf %197, %198 : vector<1x128xf32>
    %200 = arith.negf %199 : vector<1x128xf32>
    %201 = math.exp %200 : vector<1x128xf32>
    %cst_51 = arith.constant 1.000000e+00 : f32
    %202 = vector.broadcast %cst_51 : f32 to vector<1x128xf32>
    %203 = arith.addf %202, %201 : vector<1x128xf32>
    %204 = arith.divf %202, %203 : vector<1x128xf32>
    %205 = vector.extract_strided_slice %186 {offsets = [0, 256], sizes = [1, 128], strides = [1, 1]} : vector<1x384xf32> to vector<1x128xf32>
    %206 = vector.extract_strided_slice %188 {offsets = [0, 256], sizes = [1, 128], strides = [1, 1]} : vector<1x384xf32> to vector<1x128xf32>
    %207 = arith.mulf %196, %206 : vector<1x128xf32>
    %208 = arith.addf %205, %207 : vector<1x128xf32>
    %209 = math.tanh %208 : vector<1x128xf32>
    %cst_52 = arith.constant 1.000000e+00 : f32
    %210 = vector.broadcast %cst_52 : f32 to vector<1x128xf32>
    %211 = arith.subf %210, %204 : vector<1x128xf32>
    %212 = arith.mulf %211, %209 : vector<1x128xf32>
    %213 = arith.mulf %204, %184 : vector<1x128xf32>
    %214 = arith.addf %212, %213 : vector<1x128xf32>
    %c6_53 = arith.constant 6 : index
    %c0_54 = arith.constant 0 : index
    %215 = vector.load %arg5[%c6_53, %c0_54] : memref<8x128xf32, #tpu.memory_space<vmem>>, vector<1x128xf32>
    tpu.vector_store %arg5[%c6_53, %c0_54], %214 {strides = array<i32>} : memref<8x128xf32, #tpu.memory_space<vmem>>, vector<1x128xf32>,
    %c7 = arith.constant 7 : index
    %c0_55 = arith.constant 0 : index
    %216 = vector.load %arg1[%c7, %c0_55] : memref<8x384xf32, #tpu.memory_space<vmem>>, vector<1x384xf32>
    %cst_56 = arith.constant dense<0.000000e+00> : vector<1x384xf32>
    %217 = tpu.matmul %214, %3, %cst_56 {dimension_numbers = #tpu.dot_dimension_numbers<[1], [0], [0], [1], [0, 0, 1, 1], [], []>} : vector<1x128xf32>, vector<128x384xf32>, vector<1x384xf32> -> vector<1x384xf32>
    %218 = arith.addf %217, %4 : vector<1x384xf32>
    %219 = vector.extract_strided_slice %216 {offsets = [0, 0], sizes = [1, 128], strides = [1, 1]} : vector<1x384xf32> to vector<1x128xf32>
    %220 = vector.extract_strided_slice %218 {offsets = [0, 0], sizes = [1, 128], strides = [1, 1]} : vector<1x384xf32> to vector<1x128xf32>
    %221 = arith.addf %219, %220 : vector<1x128xf32>
    %222 = arith.negf %221 : vector<1x128xf32>
    %223 = math.exp %222 : vector<1x128xf32>
    %cst_57 = arith.constant 1.000000e+00 : f32
    %224 = vector.broadcast %cst_57 : f32 to vector<1x128xf32>
    %225 = arith.addf %224, %223 : vector<1x128xf32>
    %226 = arith.divf %224, %225 : vector<1x128xf32>
    %227 = vector.extract_strided_slice %216 {offsets = [0, 128], sizes = [1, 128], strides = [1, 1]} : vector<1x384xf32> to vector<1x128xf32>
    %228 = vector.extract_strided_slice %218 {offsets = [0, 128], sizes = [1, 128], strides = [1, 1]} : vector<1x384xf32> to vector<1x128xf32>
    %229 = arith.addf %227, %228 : vector<1x128xf32>
    %230 = arith.negf %229 : vector<1x128xf32>
    %231 = math.exp %230 : vector<1x128xf32>
    %cst_58 = arith.constant 1.000000e+00 : f32
    %232 = vector.broadcast %cst_58 : f32 to vector<1x128xf32>
    %233 = arith.addf %232, %231 : vector<1x128xf32>
    %234 = arith.divf %232, %233 : vector<1x128xf32>
    %235 = vector.extract_strided_slice %216 {offsets = [0, 256], sizes = [1, 128], strides = [1, 1]} : vector<1x384xf32> to vector<1x128xf32>
    %236 = vector.extract_strided_slice %218 {offsets = [0, 256], sizes = [1, 128], strides = [1, 1]} : vector<1x384xf32> to vector<1x128xf32>
    %237 = arith.mulf %226, %236 : vector<1x128xf32>
    %238 = arith.addf %235, %237 : vector<1x128xf32>
    %239 = math.tanh %238 : vector<1x128xf32>
    %cst_59 = arith.constant 1.000000e+00 : f32
    %240 = vector.broadcast %cst_59 : f32 to vector<1x128xf32>
    %241 = arith.subf %240, %234 : vector<1x128xf32>
    %242 = arith.mulf %241, %239 : vector<1x128xf32>
    %243 = arith.mulf %234, %214 : vector<1x128xf32>
    %244 = arith.addf %242, %243 : vector<1x128xf32>
    %c7_60 = arith.constant 7 : index
    %c0_61 = arith.constant 0 : index
    %245 = vector.load %arg5[%c7_60, %c0_61] : memref<8x128xf32, #tpu.memory_space<vmem>>, vector<1x128xf32>
    tpu.vector_store %arg5[%c7_60, %c0_61], %244 {strides = array<i32>} : memref<8x128xf32, #tpu.memory_space<vmem>>, vector<1x128xf32>,
    %c0_62 = arith.constant 0 : index
    %c0_63 = arith.constant 0 : index
    %246 = vector.load %arg6[%c0_62, %c0_63] : memref<1x128xf32, #tpu.memory_space<vmem>>, vector<1x128xf32>
    tpu.vector_store %arg6[%c0_62, %c0_63], %244 {strides = array<i32>} : memref<1x128xf32, #tpu.memory_space<vmem>>, vector<1x128xf32>,
    return
  }
  func.func @transform_0(%arg0: i32) -> (i32, i32) {
    %c0_i32 = arith.constant 0 : i32
    %c0_i32_0 = arith.constant 0 : i32
    return %arg0, %c0_i32 : i32, i32
  }
  func.func @transform_1(%arg0: i32) -> (i32, i32) {
    %c0_i32 = arith.constant 0 : i32
    %c0_i32_0 = arith.constant 0 : i32
    %c0_i32_1 = arith.constant 0 : i32
    return %c0_i32, %c0_i32_0 : i32, i32
  }
  func.func @transform_2(%arg0: i32) -> (i32, i32) {
    %c0_i32 = arith.constant 0 : i32
    %c0_i32_0 = arith.constant 0 : i32
    %c0_i32_1 = arith.constant 0 : i32
    return %c0_i32, %c0_i32_0 : i32, i32
  }
  func.func @transform_3(%arg0: i32) -> (i32, i32) {
    %c0_i32 = arith.constant 0 : i32
    %c0_i32_0 = arith.constant 0 : i32
    %c0_i32_1 = arith.constant 0 : i32
    return %c0_i32, %c0_i32_0 : i32, i32
  }
  func.func @transform_4(%arg0: i32) -> (i32, i32) {
    %c0_i32 = arith.constant 0 : i32
    %c0_i32_0 = arith.constant 0 : i32
    return %arg0, %c0_i32 : i32, i32
  }
}

</mosaic_0001>

<bundles_post_ra>
// kernel: encode_sequence.1
= control target key start
LH: loop header
LB: loop body
LE: loop exit
PB: predicated region body
PF: predicated region fallthrough
CT: control target
= control target key end

     0   :  { %9 = vsyncpa [#allocation4], 0  ;;  %s2465_s15 = smov [#allocation3]   ;;  %s2961_s0 = inlined_call_operand.vmem [shape: f32[8,384], index: 0, kind: input, shape index: {}]   ;;  %s2962_s1 = inlined_call_operand.vmem [shape: f32[1,128], index: 1, kind: input, shape index: {}]   ;;  %s2963_s2 = inlined_call_operand.hbm [shape: f32[128,384], index: 2, kind: input, shape index: {}]   ;;  %s2964_s3 = inlined_call_operand.vmem [shape: f32[1,384], index: 3, kind: input, shape index: {}]   ;;  %s2965_s4 = inlined_call_operand.vmem [shape: f32[8,128], index: 4, kind: output, shape index: {}]  }
   0x1   :  { %s19_s16 = sshll.u32 %s2465_s15, 4  ;;  %s2441_s19 = scalar_lea.hbm %s2963_s2, 6144  ;;  %s20_s16 = int_to_ptr.vmem [resolvable:$true] %s19_s16 }
   0x2   :  { %p2442_p0 = scmp.ne.s32.totalorder %s2963_s2, %s2441_s19  ;;  %p2445_p1 = scmp.lt.u32.totalorder %s2441_s19, %s2963_s2 }
   0x4   :  { %p2447_p2 = pnand %p2445_p1, %p2442_p0 }
   0x6   :  { %2450 = shalt.err (!%p2447_p2)
}
   0x7   :  { %s2451_s24 = scalar_lea.vmem %s20_s16, 6144  ;;  %p2456_p4 = scmp.lt.s32.totalorder %s20_s16, %s20_s16 }
   0x8   :  { %p2452_p3 = scmp.ne.s32.totalorder %s20_s16, %s2451_s24  ;;  %p2457_p5 = scmp.lt.s32.totalorder %s2451_s24, %s2451_s24 }
   0xa   :  { %p2458_p6 = por %p2457_p5, %p2456_p4 }
   0xc   :  { %p2459_p7 = pnand %p2458_p6, %p2452_p3 }
   0xe   :  { %2462 = shalt.err (!%p2459_p7)
}
   0xf   :  { %s2466_s25 = smov 384   ;;  %s2467_s26 = smov 24  }
  0x10   :  { %25 = dma.hbm_to_vmem [thread:$0]  %s2963_s2, 6144, %s20_s16, [#allocation4], %s2466_s25, %s2466_s25, %s2467_s26  }
  0x11   :  { %2463 = dma.done.wait [#allocation4], 6144  }
  0x12   :  { %2464 = vsyncadd [#allocation4], 4294961152  ;;  %v2468_v0 = vmov 0.0|0.0   ;;  %v2469_v1 = vmov 0.0   ;;  %vm2470_vm0 = vmmov 0   ;;  %v38_v2 = vld [vmem:[#allocation3 + $0x8] sm:$0xff] }
  0x13   :  { %1939 = vmatprep.subr.bf16.mxu1 %v2468_v0  ;;  %168 = vmatprep.mubr.f32.mxu0 %v2469_v1  ;;  %v41_v3 = vld [vmem:[#allocation3 + $0x20] sm:$0xff]  ;;  %v40_v6 = vld [vmem:[#allocation3 + $0x18] sm:$0xff]  ;;  %v47_v8 = vld [vmem:[#allocation3 + $0x50] sm:$0xff] }
  0x14   :  { %1659 = vmatprep.mubr.msk.f32.mxu1 %vm2470_vm0, %v2469_v1  ;;  %v37_v4 = vld [vmem:[#allocation3] sm:$0xff]  ;;  %v2512_v5 = vpack.c.bf16 %v41_v3, %v38_v2  ;;  %v44_v7 = vld [vmem:[#allocation3 + $0x38] sm:$0xff]  ;;  %v43_v11 = vld [vmem:[#allocation3 + $0x30] sm:$0xff] }
  0x15   :  { %v2514_v9 = vpack.c.bf16 %v40_v6, %v37_v4  ;;  %v2516_v10 = vpack.c.bf16 %v47_v8, %v44_v7  ;;  %v46_v12 = vld [vmem:[#allocation3 + $0x48] sm:$0xff]  ;;  %v53_v14 = vld [vmem:[#allocation3 + $0x80] sm:$0xff]  ;;  %v52_v18 = vld [vmem:[#allocation3 + $0x78] sm:$0xff] }
  0x16   :  { %v50_v13 = vld [vmem:[#allocation3 + $0x68] sm:$0xff]  ;;  %1908 = vmatprep.subr.bf16.mxu0 %v2512_v5  ;;  %v2520_v15 = vpack.c.bf16 %v46_v12, %v43_v11  ;;  %v49_v17 = vld [vmem:[#allocation3 + $0x60] sm:$0xff]  ;;  %v56_v19 = vld [vmem:[#allocation3 + $0x98] sm:$0xff] }
  0x17   :  { %1910 = vmatpush1.bf16.msra.mxu0 %v2514_v9  ;;  %v2523_v16 = vpack.c.bf16 %v53_v14, %v50_v13  ;;  %v59_v20 = vld [vmem:[#allocation3 + $0xb0] sm:$0xff]  ;;  %v2526_v21 = vpack.c.bf16 %v52_v18, %v49_v17  ;;  %v58_v24 = vld [vmem:[#allocation3 + $0xa8] sm:$0xff]  ;;  %v65_v26 = vld [vmem:[#allocation3 + $0xe0] sm:$0xff] }
  0x18   :  { %1912 = vmatprep.subr.bf16.mxu0 %v2516_v10  ;;  %v2529_v22 = vpack.c.bf16 %v59_v20, %v56_v19  ;;  %v55_v23 = vld [vmem:[#allocation3 + $0x90] sm:$0xff]  ;;  %v62_v25 = vld [vmem:[#allocation3 + $0xc8] sm:$0xff]  ;;  %v35_v30 = vld [vmem:[%s2962_s1] sm:$0x1]  ;;  %v89_v19 = vlaneseq }
  0x19   :  { %v39_v27 = vld [vmem:[#allocation3 + $0x10] sm:$0xff]  ;;  %v42_v28 = vld [vmem:[#allocation3 + $0x28] sm:$0xff]  ;;  %v45_v31 = vld [vmem:[#allocation3 + $0x40] sm:$0xff]  ;;  %v2537_v32 = vpack.c.bf16 %v58_v24, %v55_v23  ;;  %36 = vst [vmem:[#allocation2] sm:$0x1] %v35_v30  ;;  %v2540_v34 = vpack.c.bf16 %v65_v26, %v62_v25 }
  0x1a   :  { %v2531_v29 = vpack.c.bf16 %v42_v28, %v39_v27  ;;  %v48_v33 = vld [vmem:[#allocation3 + $0x58] sm:$0xff]  ;;  %v61_v35 = vld [vmem:[#allocation3 + $0xc0] sm:$0xff]  ;;  %v71_v39 = vld [vmem:[#allocation3 + $0x110] sm:$0xff]  ;;  %v90_v20 = vshrl.u32 %v89_v19, 7 }
  0x1b   :  { %1914 = vmatpush1.bf16.msra.mxu0 %v2520_v15  ;;  %v64_v36 = vld [vmem:[#allocation3 + $0xd8] sm:$0xff]  ;;  %v2543_v38 = vpack.c.bf16 %v48_v33, %v45_v31  ;;  %v51_v40 = vld [vmem:[#allocation3 + $0x70] sm:$0xff]  ;;  %v54_v41 = vld [vmem:[#allocation3 + $0x88] sm:$0xff] }
  0x1c   :  { %1916 = vmatprep.subr.bf16.mxu0 %v2523_v16  ;;  %v68_v37 = vld [vmem:[#allocation3 + $0xf8] sm:$0xff]  ;;  %1941 = vmatpush3.bf16.msra.mxu1 %v2531_v29  ;;  %v2547_v42 = vpack.c.bf16 %v64_v36, %v61_v35  ;;  %v67_v44 = vld [vmem:[#allocation3 + $0xf0] sm:$0xff]  ;;  %v70_v45 = vld [vmem:[#allocation3 + $0x108] sm:$0xff]  ;;  %v2553_v47 = vpack.c.bf16 %v54_v41, %v51_v40  ;;  %v91_v23 = vsub.s32 0, %v90_v20  ;;  %v95_v25 = vsub.s32 1, %v90_v20 }
  0x1d   :  { %1942 = vmatprep.subr.bf16.mxu1 %v2468_v0  ;;  %v2550_v43 = vpack.c.bf16 %v71_v39, %v68_v37  ;;  %v74_v46 = vld [vmem:[#allocation3 + $0x128] sm:$0xff]  ;;  %v77_v48 = vld [vmem:[#allocation3 + $0x140] sm:$0xff]  ;;  %v60_v50 = vld [vmem:[#allocation3 + $0xb8] sm:$0xff]  ;;  %v2557_v51 = vpack.c.bf16 %v70_v45, %v67_v44 }
  0x1e   :  { %v57_v49 = vld [vmem:[#allocation3 + $0xa0] sm:$0xff]  ;;  %v2560_v52 = vpack.c.bf16 %v77_v48, %v74_v46  ;;  %v76_v54 = vld [vmem:[#allocation3 + $0x138] sm:$0xff]  ;;  %v83_v57 = vld [vmem:[#allocation3 + $0x170] sm:$0xff] }
  0x1f   :  { %1918 = vmatpush1.bf16.msra.mxu0 %v2526_v21  ;;  %v73_v53 = vld [vmem:[#allocation3 + $0x120] sm:$0xff]  ;;  %v80_v55 = vld [vmem:[#allocation3 + $0x158] sm:$0xff]  ;;  %v2563_v56 = vpack.c.bf16 %v60_v50, %v57_v49  ;;  %v63_v58 = vld [vmem:[#allocation3 + $0xd0] sm:$0xff]  ;;  %v99_v49 = vsub.s32 2, %v90_v20 }
  0x20   :  { %1920 = vmatprep.subr.bf16.mxu0 %v2529_v22  ;;  %1944 = vmatpush3.bf16.msra.mxu1 %v2543_v38  ;;  %v66_v59 = vld [vmem:[#allocation3 + $0xe8] sm:$0xff]  ;;  %v2567_v60 = vpack.c.bf16 %v76_v54, %v73_v53  ;;  %v2570_v61 = vpack.c.bf16 %v83_v57, %v80_v55  ;;  %v79_v62 = vld [vmem:[#allocation3 + $0x150] sm:$0xff]  ;;  %v69_v3 = vld [vmem:[#allocation3 + $0x100] sm:$0xff] }
  0x21   :  { %1945 = vmatprep.subr.bf16.mxu1 %v2468_v0  ;;  %v82_v63 = vld [vmem:[#allocation3 + $0x168] sm:$0xff]  ;;  %v2573_v2 = vpack.c.bf16 %v66_v59, %v63_v58  ;;  %v72_v4 = vld [vmem:[#allocation3 + $0x118] sm:$0xff]  ;;  %v75_v8 = vld [vmem:[#allocation3 + $0x130] sm:$0xff] }
  0x22   :  { %v2577_v6 = vpack.c.bf16 %v82_v63, %v79_v62  ;;  %v2581_v7 = vpack.c.bf16 %v72_v4, %v69_v3  ;;  %v78_v11 = vld [vmem:[#allocation3 + $0x148] sm:$0xff]  ;;  %v2585_v12 = vld [vmem:[#allocation2] sm:$0x1]  ;;  %v81_v14 = vld [vmem:[#allocation3 + $0x160] sm:$0xff] }
  0x23   :  { %1922 = vmatpush1.bf16.msra.mxu0 %v2537_v32  ;;  %v2588_v13 = vpack.c.bf16 %v78_v11, %v75_v8  ;;  %v84_v17 = vld [vmem:[#allocation3 + $0x178] sm:$0xff] }
  0x24   :  { %1924 = vmatprep.subr.bf16.mxu0 %v2540_v34  ;;  %1947 = vmatpush3.bf16.msra.mxu1 %v2553_v47  ;;  %v2596_v18 = vpack.c.bf16 %v84_v17, %v81_v14  ;;  %v85_v24 = vld [vmem:[%s2964_s3] sm:$0x7] }
  0x25   :  { %1948 = vmatprep.subr.bf16.mxu1 %v2468_v0  ;;  %v2638_v26 = vrot.slane %v85_v24, %v91_v23  ;;  %v2640_v27 = vrot.slane %v85_v24, %v95_v25  ;;  %v87_v28 = vld [vmem:[%s2961_s0] ss:$8 sm:$0x7]  ;;  %v2647_v50 = vrot.slane %v85_v24, %v99_v49 }
  0x26   :  { %v253_v36 = vrot.slane %v87_v28, 1  ;;  %v263_v57 = vrot.slane %v87_v28, 2 }
  0x27   :  { %1926 = vmatpush1.bf16.msra.mxu0 %v2547_v42 }
  0x28   :  { %1928 = vmatprep.subr.bf16.mxu0 %v2550_v43  ;;  %1950 = vmatpush3.bf16.msra.mxu1 %v2563_v56 }
  0x29   :  { %1951 = vmatprep.subr.bf16.mxu1 %v2468_v0 }
  0x2b   :  { %1930 = vmatpush1.bf16.msra.mxu0 %v2557_v51 }
  0x2c   :  { %1932 = vmatprep.subr.bf16.mxu0 %v2560_v52  ;;  %1953 = vmatpush3.bf16.msra.mxu1 %v2573_v2 }
  0x2d   :  { %1954 = vmatprep.subr.bf16.mxu1 %v2468_v0 }
  0x2f   :  { %1934 = vmatpush1.bf16.msra.mxu0 %v2567_v60 }
  0x30   :  { %1936 = vmatprep.subr.bf16.mxu0 %v2570_v61  ;;  %1956 = vmatpush3.bf16.msra.mxu1 %v2581_v7 }
  0x31   :  { %1957 = vmatprep.subr.bf16.mxu1 %v2468_v0 }
  0x33   :  { %1938 = vmatpush1.bf16.msra.mxu0 %v2577_v6 }
  0x34   :  { %1964 = vmatprep.subr.bf16.mxu0 %v2512_v5  ;;  %1959 = vmatpush3.bf16.msra.mxu1 %v2588_v13 }
  0x35   :  { %1960 = vmatprep.subr.bf16.mxu1 %v2468_v0 }
  0x36   :  { %169 = vmatmul.mubr.f32.vlgmr.msra.gmra.mrb[0].mxu0 %v2585_v12 }
  0x37   :  { %1966 = vmatpush1.bf16.msra.mxu0 %v2514_v9  ;;  %338 = vmatprep.mubr.f32.mxu0 %v2469_v1 }
  0x38   :  { %1968 = vmatprep.subr.bf16.mxu0 %v2516_v10  ;;  %1962 = vmatpush3.bf16.msra.mxu1 %v2596_v18 }
  0x39   :  { %1995 = vmatprep.subr.bf16.mxu1 %v2468_v0 }
  0x3b   :  { %1970 = vmatpush1.bf16.msra.mxu0 %v2520_v15  ;;  %1660 = vmatmul.mubr.f32.vlgmr.msra.gmra.mrb[0].mxu1 %v2585_v12 }
  0x3c   :  { %1972 = vmatprep.subr.bf16.mxu0 %v2523_v16  ;;  %1997 = vmatpush3.bf16.msra.mxu1 %v2531_v29 }
  0x3d   :  { %1998 = vmatprep.subr.bf16.mxu1 %v2468_v0  ;;  %1694 = vmatprep.mubr.msk.f32.mxu1 %vm2470_vm0, %v2469_v1 }
  0x3f   :  { %1974 = vmatpush1.bf16.msra.mxu0 %v2526_v21 }
  0x40   :  { %1976 = vmatprep.subr.bf16.mxu0 %v2529_v22  ;;  %2000 = vmatpush3.bf16.msra.mxu1 %v2543_v38 }
  0x41   :  { %2001 = vmatprep.subr.bf16.mxu1 %v2468_v0 }
  0x43   :  { %1978 = vmatpush1.bf16.msra.mxu0 %v2537_v32 }
  0x44   :  { %1980 = vmatprep.subr.bf16.mxu0 %v2540_v34  ;;  %2003 = vmatpush3.bf16.msra.mxu1 %v2553_v47 }
  0x45   :  { %2004 = vmatprep.subr.bf16.mxu1 %v2468_v0 }
  0x47   :  { %1982 = vmatpush1.bf16.msra.mxu0 %v2547_v42 }
  0x48   :  { %1984 = vmatprep.subr.bf16.mxu0 %v2550_v43  ;;  %2006 = vmatpush3.bf16.msra.mxu1 %v2563_v56 }
  0x49   :  { %2007 = vmatprep.subr.bf16.mxu1 %v2468_v0 }
  0x4b   :  { %1986 = vmatpush1.bf16.msra.mxu0 %v2557_v51 }
  0x4c   :  { %1988 = vmatprep.subr.bf16.mxu0 %v2560_v52  ;;  %2009 = vmatpush3.bf16.msra.mxu1 %v2573_v2 }
  0x4d   :  { %2010 = vmatprep.subr.bf16.mxu1 %v2468_v0 }
  0x4f   :  { %1990 = vmatpush1.bf16.msra.mxu0 %v2567_v60 }
  0x50   :  { %1992 = vmatprep.subr.bf16.mxu0 %v2570_v61  ;;  %2012 = vmatpush3.bf16.msra.mxu1 %v2581_v7 }
  0x51   :  { %2013 = vmatprep.subr.bf16.mxu1 %v2468_v0 }
  0x53   :  { %1994 = vmatpush1.bf16.msra.mxu0 %v2577_v6 }
  0x54   :  { %2020 = vmatprep.subr.bf16.mxu0 %v2512_v5  ;;  %2015 = vmatpush3.bf16.msra.mxu1 %v2588_v13 }
  0x55   :  { %2016 = vmatprep.subr.bf16.mxu1 %v2468_v0 }
  0x58   :  { %2018 = vmatpush3.bf16.msra.mxu1 %v2596_v18 }
  0x59   :  { %2051 = vmatprep.subr.bf16.mxu1 %v2468_v0 }
 0x109   :  { %v170_v30 = vpop.f32.mrb[0].mxu0 }
 0x10a   :  { %v171_v31 = vadd.f32 %v170_v30, %v2638_v26  ;;  %v172_v33 = vpop.f32.mrb[1].mxu0 }
 0x10b   :  { %v173_v35 = vadd.f32 %v172_v33, %v2640_v27 }
 0x10c   :  { %v245_v37 = vadd.f32 %v171_v31, %v87_v28 }
 0x10d   :  { %v255_v40 = vadd.f32 %v253_v36, %v173_v35 }
 0x10e   :  { %v1468_v39 = vmul.f32 -1.442695, %v245_v37  ;;  %v241_v41 = vpop.f32.mrb[0].mxu1 }
 0x10f   :  { %v1469_v44 = vmul.f32 -1.442695, %v255_v40  ;;  %v1661_v45 = vpop.f32.mrb[1].mxu1  ;;  %v242_v55 = vadd.f32 %v241_v41, %v2647_v50 }
 0x110   :  { %2361 = vpow2.f32 %v1468_v39 }
 0x111   :  { %2363 = vpow2.f32 %v1469_v44 }
 0x11a   :  { %v2362_v46 = vpop.eup %2361 }
 0x11b   :  { %v249_v48 = vadd.f32 1.0, %v2362_v46  ;;  %v2364_v53 = vpop.eup %2363 }
 0x11c   :  { %v259_v54 = vadd.f32 1.0, %v2364_v53 }
 0x11d   :  { %2365 = vrcp.f32 %v249_v48 }
 0x11e   :  { %2367 = vrcp.f32 %v259_v54 }
 0x127   :  { %v2366_v58 = vpop.eup %2365 }
 0x128   :  { %v262_v59 = vmul.f32 %v2366_v58, %v242_v55  ;;  %v2368_v63 = vpop.eup %2367 }
 0x129   :  { %v267_v3 = vsub.f32 1.0, %v2368_v63  ;;  %v269_v11 = vmul.f32 %v2368_v63, %v2585_v12  ;;  %v1470_v12 = vld [vmem:[%s2961_s0 + $0x1] ss:$8 sm:$0x7] }
 0x12a   :  { %v265_v62 = vadd.f32 %v263_v57, %v262_v59  ;;  %v423_v28 = vrot.slane %v1470_v12, 1  ;;  %v433_v44 = vrot.slane %v1470_v12, 2  ;;  %v1473_v59 = vld [vmem:[%s2961_s0 + $0x2] ss:$8 sm:$0x7] }
 0x12c   :  { %2369 = vtanh.f32 %v265_v62 }
 0x136   :  { %v2370_v4 = vpop.eup %2369 }
 0x137   :  { %v268_v8 = vmul.f32 %v2370_v4, %v267_v3 }
 0x139   :  { %v2651_v14 = vadd.f32 %v269_v11, %v268_v8 }
 0x13b   :  { %271 = vst [vmem:[%s2965_s4] sm:$0x1] %v2651_v14  ;;  %339 = vmatmul.mubr.f32.vlgmr.msra.gmra.mrb[2].mxu0 %v2651_v14  ;;  %1695 = vmatmul.mubr.f32.vlgmr.msra.gmra.mrb[2].mxu1 %v2651_v14 }
 0x13c   :  { %2022 = vmatpush1.bf16.msra.mxu0 %v2514_v9  ;;  %2053 = vmatpush3.bf16.msra.mxu1 %v2531_v29 }
 0x13d   :  { %2024 = vmatprep.subr.bf16.mxu0 %v2516_v10  ;;  %2054 = vmatprep.subr.bf16.mxu1 %v2468_v0 }
 0x13e   :  { %508 = vmatprep.mubr.f32.mxu0 %v2469_v1  ;;  %1729 = vmatprep.mubr.msk.f32.mxu1 %vm2470_vm0, %v2469_v1 }
 0x140   :  { %2026 = vmatpush1.bf16.msra.mxu0 %v2520_v15  ;;  %2056 = vmatpush3.bf16.msra.mxu1 %v2543_v38 }
 0x141   :  { %2028 = vmatprep.subr.bf16.mxu0 %v2523_v16  ;;  %2057 = vmatprep.subr.bf16.mxu1 %v2468_v0 }
 0x144   :  { %2030 = vmatpush1.bf16.msra.mxu0 %v2526_v21  ;;  %2059 = vmatpush3.bf16.msra.mxu1 %v2553_v47 }
 0x145   :  { %2032 = vmatprep.subr.bf16.mxu0 %v2529_v22  ;;  %2060 = vmatprep.subr.bf16.mxu1 %v2468_v0 }
 0x148   :  { %2034 = vmatpush1.bf16.msra.mxu0 %v2537_v32  ;;  %2062 = vmatpush3.bf16.msra.mxu1 %v2563_v56 }
 0x149   :  { %2036 = vmatprep.subr.bf16.mxu0 %v2540_v34  ;;  %2063 = vmatprep.subr.bf16.mxu1 %v2468_v0 }
 0x14c   :  { %2038 = vmatpush1.bf16.msra.mxu0 %v2547_v42  ;;  %2065 = vmatpush3.bf16.msra.mxu1 %v2573_v2 }
 0x14d   :  { %2040 = vmatprep.subr.bf16.mxu0 %v2550_v43  ;;  %2066 = vmatprep.subr.bf16.mxu1 %v2468_v0 }
 0x150   :  { %2042 = vmatpush1.bf16.msra.mxu0 %v2557_v51  ;;  %2068 = vmatpush3.bf16.msra.mxu1 %v2581_v7 }
 0x151   :  { %2044 = vmatprep.subr.bf16.mxu0 %v2560_v52  ;;  %2069 = vmatprep.subr.bf16.mxu1 %v2468_v0 }
 0x154   :  { %2046 = vmatpush1.bf16.msra.mxu0 %v2567_v60  ;;  %2071 = vmatpush3.bf16.msra.mxu1 %v2588_v13 }
 0x155   :  { %2048 = vmatprep.subr.bf16.mxu0 %v2570_v61  ;;  %2072 = vmatprep.subr.bf16.mxu1 %v2468_v0 }
 0x158   :  { %2050 = vmatpush1.bf16.msra.mxu0 %v2577_v6  ;;  %2074 = vmatpush3.bf16.msra.mxu1 %v2596_v18 }
 0x159   :  { %2076 = vmatprep.subr.bf16.mxu0 %v2512_v5  ;;  %2107 = vmatprep.subr.bf16.mxu1 %v2468_v0 }
 0x20e   :  { %v340_v17 = vpop.f32.mrb[2].mxu0  ;;  %v411_v19 = vpop.f32.mrb[2].mxu1 }
 0x20f   :  { %v341_v20 = vadd.f32 %v340_v17, %v2638_v26  ;;  %v342_v23 = vpop.f32.mrb[3].mxu0  ;;  %v1696_v24 = vpop.f32.mrb[3].mxu1  ;;  %v412_v41 = vadd.f32 %v411_v19, %v2647_v50 }
 0x210   :  { %v343_v25 = vadd.f32 %v342_v23, %v2640_v27 }
 0x211   :  { %v415_v30 = vadd.f32 %v1470_v12, %v341_v20 }
 0x212   :  { %v425_v33 = vadd.f32 %v423_v28, %v343_v25 }
 0x213   :  { %v1471_v31 = vmul.f32 -1.442695, %v415_v30 }
 0x214   :  { %v1472_v35 = vmul.f32 -1.442695, %v425_v33 }
 0x215   :  { %2371 = vpow2.f32 %v1471_v31  ;;  %v603_v31 = vrot.slane %v1473_v59, 2 }
 0x216   :  { %2373 = vpow2.f32 %v1472_v35 }
 0x21f   :  { %v2372_v36 = vpop.eup %2371 }
 0x220   :  { %v419_v37 = vadd.f32 1.0, %v2372_v36  ;;  %v2374_v39 = vpop.eup %2373 }
 0x221   :  { %v429_v40 = vadd.f32 1.0, %v2374_v39 }
 0x222   :  { %2375 = vrcp.f32 %v419_v37 }
 0x223   :  { %2377 = vrcp.f32 %v429_v40 }
 0x22c   :  { %v2376_v45 = vpop.eup %2375 }
 0x22d   :  { %v432_v46 = vmul.f32 %v2376_v45, %v412_v41  ;;  %v2378_v49 = vpop.eup %2377 }
 0x22e   :  { %v437_v53 = vsub.f32 1.0, %v2378_v49  ;;  %v439_v57 = vmul.f32 %v2378_v49, %v2651_v14  ;;  %v593_v14 = vrot.slane %v1473_v59, 1 }
 0x22f   :  { %v435_v48 = vadd.f32 %v433_v44, %v432_v46  ;;  %v1476_v46 = vld [vmem:[%s2961_s0 + $0x3] ss:$8 sm:$0x7] }
 0x231   :  { %2379 = vtanh.f32 %v435_v48 }
 0x23b   :  { %v2380_v54 = vpop.eup %2379 }
 0x23c   :  { %v438_v55 = vmul.f32 %v2380_v54, %v437_v53 }
 0x23e   :  { %v2701_v58 = vadd.f32 %v439_v57, %v438_v55 }
 0x240   :  { %441 = vst [vmem:[%s2965_s4 + $0x1] sm:$0x1] %v2701_v58  ;;  %509 = vmatmul.mubr.f32.vlgmr.msra.gmra.mrb[4].mxu0 %v2701_v58  ;;  %1730 = vmatmul.mubr.f32.vlgmr.msra.gmra.mrb[4].mxu1 %v2701_v58 }
 0x241   :  { %2078 = vmatpush1.bf16.msra.mxu0 %v2514_v9  ;;  %2109 = vmatpush3.bf16.msra.mxu1 %v2531_v29 }
 0x242   :  { %2080 = vmatprep.subr.bf16.mxu0 %v2516_v10  ;;  %2110 = vmatprep.subr.bf16.mxu1 %v2468_v0 }
 0x243   :  { %678 = vmatprep.mubr.f32.mxu0 %v2469_v1  ;;  %1764 = vmatprep.mubr.msk.f32.mxu1 %vm2470_vm0, %v2469_v1 }
 0x245   :  { %2082 = vmatpush1.bf16.msra.mxu0 %v2520_v15  ;;  %2112 = vmatpush3.bf16.msra.mxu1 %v2543_v38 }
 0x246   :  { %2084 = vmatprep.subr.bf16.mxu0 %v2523_v16  ;;  %2113 = vmatprep.subr.bf16.mxu1 %v2468_v0 }
 0x249   :  { %2086 = vmatpush1.bf16.msra.mxu0 %v2526_v21  ;;  %2115 = vmatpush3.bf16.msra.mxu1 %v2553_v47 }
 0x24a   :  { %2088 = vmatprep.subr.bf16.mxu0 %v2529_v22  ;;  %2116 = vmatprep.subr.bf16.mxu1 %v2468_v0 }
 0x24d   :  { %2090 = vmatpush1.bf16.msra.mxu0 %v2537_v32  ;;  %2118 = vmatpush3.bf16.msra.mxu1 %v2563_v56 }
 0x24e   :  { %2092 = vmatprep.subr.bf16.mxu0 %v2540_v34  ;;  %2119 = vmatprep.subr.bf16.mxu1 %v2468_v0 }
 0x251   :  { %2094 = vmatpush1.bf16.msra.mxu0 %v2547_v42  ;;  %2121 = vmatpush3.bf16.msra.mxu1 %v2573_v2 }
 0x252   :  { %2096 = vmatprep.subr.bf16.mxu0 %v2550_v43  ;;  %2122 = vmatprep.subr.bf16.mxu1 %v2468_v0 }
 0x255   :  { %2098 = vmatpush1.bf16.msra.mxu0 %v2557_v51  ;;  %2124 = vmatpush3.bf16.msra.mxu1 %v2581_v7 }
 0x256   :  { %2100 = vmatprep.subr.bf16.mxu0 %v2560_v52  ;;  %2125 = vmatprep.subr.bf16.mxu1 %v2468_v0 }
 0x259   :  { %2102 = vmatpush1.bf16.msra.mxu0 %v2567_v60  ;;  %2127 = vmatpush3.bf16.msra.mxu1 %v2588_v13 }
 0x25a   :  { %2104 = vmatprep.subr.bf16.mxu0 %v2570_v61  ;;  %2128 = vmatprep.subr.bf16.mxu1 %v2468_v0 }
 0x25d   :  { %2106 = vmatpush1.bf16.msra.mxu0 %v2577_v6  ;;  %2130 = vmatpush3.bf16.msra.mxu1 %v2596_v18 }
 0x25e   :  { %2132 = vmatprep.subr.bf16.mxu0 %v2512_v5  ;;  %2163 = vmatprep.subr.bf16.mxu1 %v2468_v0 }
 0x313   :  { %v510_v62 = vpop.f32.mrb[4].mxu0  ;;  %v581_v63 = vpop.f32.mrb[4].mxu1 }
 0x314   :  { %v511_v3 = vadd.f32 %v510_v62, %v2638_v26  ;;  %v512_v4 = vpop.f32.mrb[5].mxu0  ;;  %v1731_v8 = vpop.f32.mrb[5].mxu1  ;;  %v582_v30 = vadd.f32 %v581_v63, %v2647_v50 }
 0x315   :  { %v513_v11 = vadd.f32 %v512_v4, %v2640_v27 }
 0x316   :  { %v585_v12 = vadd.f32 %v1473_v59, %v511_v3 }
 0x317   :  { %v595_v19 = vadd.f32 %v593_v14, %v513_v11 }
 0x318   :  { %v1474_v17 = vmul.f32 -1.442695, %v585_v12 }
 0x319   :  { %v1475_v20 = vmul.f32 -1.442695, %v595_v19 }
 0x31a   :  { %2381 = vpow2.f32 %v1474_v17  ;;  %v773_v17 = vrot.slane %v1476_v46, 2 }
 0x31b   :  { %2383 = vpow2.f32 %v1475_v20 }
 0x324   :  { %v2382_v23 = vpop.eup %2381 }
 0x325   :  { %v589_v24 = vadd.f32 1.0, %v2382_v23  ;;  %v2384_v25 = vpop.eup %2383 }
 0x326   :  { %v599_v28 = vadd.f32 1.0, %v2384_v25 }
 0x327   :  { %2385 = vrcp.f32 %v589_v24 }
 0x328   :  { %2387 = vrcp.f32 %v599_v28 }
 0x331   :  { %v2386_v33 = vpop.eup %2385 }
 0x332   :  { %v602_v35 = vmul.f32 %v2386_v33, %v582_v30  ;;  %v2388_v37 = vpop.eup %2387 }
 0x333   :  { %v607_v39 = vsub.f32 1.0, %v2388_v37  ;;  %v609_v44 = vmul.f32 %v2388_v37, %v2701_v58  ;;  %v763_v58 = vrot.slane %v1476_v46, 1 }
 0x334   :  { %v605_v36 = vadd.f32 %v603_v31, %v602_v35  ;;  %v1479_v35 = vld [vmem:[%s2961_s0 + $0x4] ss:$8 sm:$0x7] }
 0x336   :  { %2389 = vtanh.f32 %v605_v36 }
 0x340   :  { %v2390_v40 = vpop.eup %2389 }
 0x341   :  { %v608_v41 = vmul.f32 %v2390_v40, %v607_v39 }
 0x343   :  { %v2751_v45 = vadd.f32 %v609_v44, %v608_v41 }
 0x345   :  { %611 = vst [vmem:[%s2965_s4 + $0x2] sm:$0x1] %v2751_v45  ;;  %679 = vmatmul.mubr.f32.vlgmr.msra.gmra.mrb[6].mxu0 %v2751_v45  ;;  %1765 = vmatmul.mubr.f32.vlgmr.msra.gmra.mrb[6].mxu1 %v2751_v45 }
 0x346   :  { %2134 = vmatpush1.bf16.msra.mxu0 %v2514_v9  ;;  %2165 = vmatpush3.bf16.msra.mxu1 %v2531_v29 }
 0x347   :  { %2136 = vmatprep.subr.bf16.mxu0 %v2516_v10  ;;  %2166 = vmatprep.subr.bf16.mxu1 %v2468_v0 }
 0x348   :  { %848 = vmatprep.mubr.f32.mxu0 %v2469_v1  ;;  %1799 = vmatprep.mubr.msk.f32.mxu1 %vm2470_vm0, %v2469_v1 }
 0x34a   :  { %2138 = vmatpush1.bf16.msra.mxu0 %v2520_v15  ;;  %2168 = vmatpush3.bf16.msra.mxu1 %v2543_v38 }
 0x34b   :  { %2140 = vmatprep.subr.bf16.mxu0 %v2523_v16  ;;  %2169 = vmatprep.subr.bf16.mxu1 %v2468_v0 }
 0x34e   :  { %2142 = vmatpush1.bf16.msra.mxu0 %v2526_v21  ;;  %2171 = vmatpush3.bf16.msra.mxu1 %v2553_v47 }
 0x34f   :  { %2144 = vmatprep.subr.bf16.mxu0 %v2529_v22  ;;  %2172 = vmatprep.subr.bf16.mxu1 %v2468_v0 }
 0x352   :  { %2146 = vmatpush1.bf16.msra.mxu0 %v2537_v32  ;;  %2174 = vmatpush3.bf16.msra.mxu1 %v2563_v56 }
 0x353   :  { %2148 = vmatprep.subr.bf16.mxu0 %v2540_v34  ;;  %2175 = vmatprep.subr.bf16.mxu1 %v2468_v0 }
 0x356   :  { %2150 = vmatpush1.bf16.msra.mxu0 %v2547_v42  ;;  %2177 = vmatpush3.bf16.msra.mxu1 %v2573_v2 }
 0x357   :  { %2152 = vmatprep.subr.bf16.mxu0 %v2550_v43  ;;  %2178 = vmatprep.subr.bf16.mxu1 %v2468_v0 }
 0x35a   :  { %2154 = vmatpush1.bf16.msra.mxu0 %v2557_v51  ;;  %2180 = vmatpush3.bf16.msra.mxu1 %v2581_v7 }
 0x35b   :  { %2156 = vmatprep.subr.bf16.mxu0 %v2560_v52  ;;  %2181 = vmatprep.subr.bf16.mxu1 %v2468_v0 }
 0x35e   :  { %2158 = vmatpush1.bf16.msra.mxu0 %v2567_v60  ;;  %2183 = vmatpush3.bf16.msra.mxu1 %v2588_v13 }
 0x35f   :  { %2160 = vmatprep.subr.bf16.mxu0 %v2570_v61  ;;  %2184 = vmatprep.subr.bf16.mxu1 %v2468_v0 }
 0x362   :  { %2162 = vmatpush1.bf16.msra.mxu0 %v2577_v6  ;;  %2186 = vmatpush3.bf16.msra.mxu1 %v2596_v18 }
 0x363   :  { %2188 = vmatprep.subr.bf16.mxu0 %v2512_v5  ;;  %2219 = vmatprep.subr.bf16.mxu1 %v2468_v0 }
 0x418   :  { %v680_v48 = vpop.f32.mrb[6].mxu0  ;;  %v751_v49 = vpop.f32.mrb[6].mxu1 }
 0x419   :  { %v681_v53 = vadd.f32 %v680_v48, %v2638_v26  ;;  %v682_v54 = vpop.f32.mrb[7].mxu0  ;;  %v1766_v55 = vpop.f32.mrb[7].mxu1  ;;  %v752_v12 = vadd.f32 %v751_v49, %v2647_v50 }
 0x41a   :  { %v683_v57 = vadd.f32 %v682_v54, %v2640_v27 }
 0x41b   :  { %v755_v59 = vadd.f32 %v1476_v46, %v681_v53 }
 0x41c   :  { %v765_v63 = vadd.f32 %v763_v58, %v683_v57 }
 0x41d   :  { %v1477_v62 = vmul.f32 -1.442695, %v755_v59 }
 0x41e   :  { %v1478_v3 = vmul.f32 -1.442695, %v765_v63 }
 0x41f   :  { %2391 = vpow2.f32 %v1477_v62  ;;  %v943_v62 = vrot.slane %v1479_v35, 2 }
 0x420   :  { %2393 = vpow2.f32 %v1478_v3 }
 0x429   :  { %v2392_v4 = vpop.eup %2391 }
 0x42a   :  { %v759_v8 = vadd.f32 1.0, %v2392_v4  ;;  %v2394_v11 = vpop.eup %2393 }
 0x42b   :  { %v769_v14 = vadd.f32 1.0, %v2394_v11 }
 0x42c   :  { %2395 = vrcp.f32 %v759_v8 }
 0x42d   :  { %2397 = vrcp.f32 %v769_v14 }
 0x436   :  { %v2396_v19 = vpop.eup %2395 }
 0x437   :  { %v772_v20 = vmul.f32 %v2396_v19, %v752_v12  ;;  %v2398_v24 = vpop.eup %2397 }
 0x438   :  { %v777_v25 = vsub.f32 1.0, %v2398_v24  ;;  %v779_v31 = vmul.f32 %v2398_v24, %v2751_v45  ;;  %v933_v45 = vrot.slane %v1479_v35, 1 }
 0x439   :  { %v775_v23 = vadd.f32 %v773_v17, %v772_v20  ;;  %v1482_v20 = vld [vmem:[%s2961_s0 + $0x5] ss:$8 sm:$0x7] }
 0x43b   :  { %2399 = vtanh.f32 %v775_v23 }
 0x445   :  { %v2400_v28 = vpop.eup %2399 }
 0x446   :  { %v778_v30 = vmul.f32 %v2400_v28, %v777_v25 }
 0x448   :  { %v2801_v33 = vadd.f32 %v779_v31, %v778_v30 }
 0x44a   :  { %781 = vst [vmem:[%s2965_s4 + $0x3] sm:$0x1] %v2801_v33  ;;  %849 = vmatmul.mubr.f32.vlgmr.msra.gmra.mrb[8].mxu0 %v2801_v33  ;;  %1800 = vmatmul.mubr.f32.vlgmr.msra.gmra.mrb[8].mxu1 %v2801_v33 }
 0x44b   :  { %2190 = vmatpush1.bf16.msra.mxu0 %v2514_v9  ;;  %2221 = vmatpush3.bf16.msra.mxu1 %v2531_v29 }
 0x44c   :  { %2192 = vmatprep.subr.bf16.mxu0 %v2516_v10  ;;  %2222 = vmatprep.subr.bf16.mxu1 %v2468_v0 }
 0x44d   :  { %1018 = vmatprep.mubr.f32.mxu0 %v2469_v1  ;;  %1834 = vmatprep.mubr.msk.f32.mxu1 %vm2470_vm0, %v2469_v1 }
 0x44f   :  { %2194 = vmatpush1.bf16.msra.mxu0 %v2520_v15  ;;  %2224 = vmatpush3.bf16.msra.mxu1 %v2543_v38 }
 0x450   :  { %2196 = vmatprep.subr.bf16.mxu0 %v2523_v16  ;;  %2225 = vmatprep.subr.bf16.mxu1 %v2468_v0 }
 0x453   :  { %2198 = vmatpush1.bf16.msra.mxu0 %v2526_v21  ;;  %2227 = vmatpush3.bf16.msra.mxu1 %v2553_v47 }
 0x454   :  { %2200 = vmatprep.subr.bf16.mxu0 %v2529_v22  ;;  %2228 = vmatprep.subr.bf16.mxu1 %v2468_v0 }
 0x457   :  { %2202 = vmatpush1.bf16.msra.mxu0 %v2537_v32  ;;  %2230 = vmatpush3.bf16.msra.mxu1 %v2563_v56 }
 0x458   :  { %2204 = vmatprep.subr.bf16.mxu0 %v2540_v34  ;;  %2231 = vmatprep.subr.bf16.mxu1 %v2468_v0 }
 0x45b   :  { %2206 = vmatpush1.bf16.msra.mxu0 %v2547_v42  ;;  %2233 = vmatpush3.bf16.msra.mxu1 %v2573_v2 }
 0x45c   :  { %2208 = vmatprep.subr.bf16.mxu0 %v2550_v43  ;;  %2234 = vmatprep.subr.bf16.mxu1 %v2468_v0 }
 0x45f   :  { %2210 = vmatpush1.bf16.msra.mxu0 %v2557_v51  ;;  %2236 = vmatpush3.bf16.msra.mxu1 %v2581_v7 }
 0x460   :  { %2212 = vmatprep.subr.bf16.mxu0 %v2560_v52  ;;  %2237 = vmatprep.subr.bf16.mxu1 %v2468_v0 }
 0x463   :  { %2214 = vmatpush1.bf16.msra.mxu0 %v2567_v60  ;;  %2239 = vmatpush3.bf16.msra.mxu1 %v2588_v13 }
 0x464   :  { %2216 = vmatprep.subr.bf16.mxu0 %v2570_v61  ;;  %2240 = vmatprep.subr.bf16.mxu1 %v2468_v0 }
 0x467   :  { %2218 = vmatpush1.bf16.msra.mxu0 %v2577_v6  ;;  %2242 = vmatpush3.bf16.msra.mxu1 %v2596_v18 }
 0x468   :  { %2244 = vmatprep.subr.bf16.mxu0 %v2512_v5  ;;  %2275 = vmatprep.subr.bf16.mxu1 %v2468_v0 }
 0x51d   :  { %v850_v36 = vpop.f32.mrb[8].mxu0  ;;  %v921_v37 = vpop.f32.mrb[8].mxu1 }
 0x51e   :  { %v851_v39 = vadd.f32 %v850_v36, %v2638_v26  ;;  %v852_v40 = vpop.f32.mrb[9].mxu0  ;;  %v1801_v41 = vpop.f32.mrb[9].mxu1  ;;  %v922_v59 = vadd.f32 %v921_v37, %v2647_v50 }
 0x51f   :  { %v853_v44 = vadd.f32 %v852_v40, %v2640_v27 }
 0x520   :  { %v925_v46 = vadd.f32 %v1479_v35, %v851_v39 }
 0x521   :  { %v935_v49 = vadd.f32 %v933_v45, %v853_v44 }
 0x522   :  { %v1480_v48 = vmul.f32 -1.442695, %v925_v46  ;;  %v1113_v46 = vrot.slane %v1482_v20, 2 }
 0x523   :  { %v1481_v53 = vmul.f32 -1.442695, %v935_v49 }
 0x524   :  { %2401 = vpow2.f32 %v1480_v48 }
 0x525   :  { %2403 = vpow2.f32 %v1481_v53 }
 0x52e   :  { %v2402_v54 = vpop.eup %2401 }
 0x52f   :  { %v929_v55 = vadd.f32 1.0, %v2402_v54  ;;  %v2404_v57 = vpop.eup %2403 }
 0x530   :  { %v939_v58 = vadd.f32 1.0, %v2404_v57 }
 0x531   :  { %2405 = vrcp.f32 %v929_v55 }
 0x532   :  { %2407 = vrcp.f32 %v939_v58 }
 0x53b   :  { %v2406_v63 = vpop.eup %2405 }
 0x53c   :  { %v942_v3 = vmul.f32 %v2406_v63, %v922_v59  ;;  %v2408_v8 = vpop.eup %2407 }
 0x53d   :  { %v947_v11 = vsub.f32 1.0, %v2408_v8  ;;  %v949_v17 = vmul.f32 %v2408_v8, %v2801_v33  ;;  %v1103_v33 = vrot.slane %v1482_v20, 1 }
 0x53e   :  { %v945_v4 = vadd.f32 %v943_v62, %v942_v3 }
 0x540   :  { %2409 = vtanh.f32 %v945_v4  ;;  %v1488_v4 = vld [vmem:[%s2961_s0 + $0x7] ss:$8 sm:$0x7] }
 0x54a   :  { %v2410_v14 = vpop.eup %2409 }
 0x54b   :  { %v948_v12 = vmul.f32 %v2410_v14, %v947_v11 }
 0x54d   :  { %v2851_v19 = vadd.f32 %v949_v17, %v948_v12 }
 0x54f   :  { %951 = vst [vmem:[%s2965_s4 + $0x4] sm:$0x1] %v2851_v19  ;;  %1019 = vmatmul.mubr.f32.vlgmr.msra.gmra.mrb[10].mxu0 %v2851_v19  ;;  %1835 = vmatmul.mubr.f32.vlgmr.msra.gmra.mrb[10].mxu1 %v2851_v19 }
 0x550   :  { %2246 = vmatpush1.bf16.msra.mxu0 %v2514_v9  ;;  %2277 = vmatpush3.bf16.msra.mxu1 %v2531_v29 }
 0x551   :  { %2248 = vmatprep.subr.bf16.mxu0 %v2516_v10  ;;  %2278 = vmatprep.subr.bf16.mxu1 %v2468_v0 }
 0x552   :  { %1188 = vmatprep.mubr.f32.mxu0 %v2469_v1  ;;  %1869 = vmatprep.mubr.msk.f32.mxu1 %vm2470_vm0, %v2469_v1 }
 0x554   :  { %2250 = vmatpush1.bf16.msra.mxu0 %v2520_v15  ;;  %2280 = vmatpush3.bf16.msra.mxu1 %v2543_v38 }
 0x555   :  { %2252 = vmatprep.subr.bf16.mxu0 %v2523_v16  ;;  %2281 = vmatprep.subr.bf16.mxu1 %v2468_v0 }
 0x558   :  { %2254 = vmatpush1.bf16.msra.mxu0 %v2526_v21  ;;  %2283 = vmatpush3.bf16.msra.mxu1 %v2553_v47 }
 0x559   :  { %2256 = vmatprep.subr.bf16.mxu0 %v2529_v22  ;;  %2284 = vmatprep.subr.bf16.mxu1 %v2468_v0 }
 0x55c   :  { %2258 = vmatpush1.bf16.msra.mxu0 %v2537_v32  ;;  %2286 = vmatpush3.bf16.msra.mxu1 %v2563_v56 }
 0x55d   :  { %2260 = vmatprep.subr.bf16.mxu0 %v2540_v34  ;;  %2287 = vmatprep.subr.bf16.mxu1 %v2468_v0 }
 0x560   :  { %2262 = vmatpush1.bf16.msra.mxu0 %v2547_v42  ;;  %2289 = vmatpush3.bf16.msra.mxu1 %v2573_v2 }
 0x561   :  { %2264 = vmatprep.subr.bf16.mxu0 %v2550_v43  ;;  %2290 = vmatprep.subr.bf16.mxu1 %v2468_v0 }
 0x564   :  { %2266 = vmatpush1.bf16.msra.mxu0 %v2557_v51  ;;  %2292 = vmatpush3.bf16.msra.mxu1 %v2581_v7 }
 0x565   :  { %2268 = vmatprep.subr.bf16.mxu0 %v2560_v52  ;;  %2293 = vmatprep.subr.bf16.mxu1 %v2468_v0 }
 0x568   :  { %2270 = vmatpush1.bf16.msra.mxu0 %v2567_v60  ;;  %2295 = vmatpush3.bf16.msra.mxu1 %v2588_v13 }
 0x569   :  { %2272 = vmatprep.subr.bf16.mxu0 %v2570_v61  ;;  %2296 = vmatprep.subr.bf16.mxu1 %v2468_v0 }
 0x56c   :  { %2274 = vmatpush1.bf16.msra.mxu0 %v2577_v6  ;;  %2298 = vmatpush3.bf16.msra.mxu1 %v2596_v18 }
 0x56d   :  { %2300 = vmatprep.subr.bf16.mxu0 %v2512_v5  ;;  %2331 = vmatprep.subr.bf16.mxu1 %v2468_v0 }
 0x622   :  { %v1020_v23 = vpop.f32.mrb[10].mxu0  ;;  %v1091_v24 = vpop.f32.mrb[10].mxu1 }
 0x623   :  { %v1021_v25 = vadd.f32 %v1020_v23, %v2638_v26  ;;  %v1022_v28 = vpop.f32.mrb[11].mxu0  ;;  %v1836_v30 = vpop.f32.mrb[11].mxu1  ;;  %v1092_v45 = vadd.f32 %v1091_v24, %v2647_v50 }
 0x624   :  { %v1023_v31 = vadd.f32 %v1022_v28, %v2640_v27 }
 0x625   :  { %v1095_v35 = vadd.f32 %v1482_v20, %v1021_v25  ;;  %v1443_v20 = vrot.slane %v1488_v4, 1 }
 0x626   :  { %v1105_v37 = vadd.f32 %v1103_v33, %v1023_v31 }
 0x627   :  { %v1483_v36 = vmul.f32 -1.442695, %v1095_v35 }
 0x628   :  { %v1484_v5 = vmul.f32 -1.442695, %v1105_v37  ;;  %v1453_v37 = vrot.slane %v1488_v4, 2 }
 0x629   :  { %2411 = vpow2.f32 %v1483_v36 }
 0x62a   :  { %2413 = vpow2.f32 %v1484_v5 }
 0x633   :  { %v2412_v39 = vpop.eup %2411 }
 0x634   :  { %v1099_v40 = vadd.f32 1.0, %v2412_v39  ;;  %v2414_v41 = vpop.eup %2413 }
 0x635   :  { %v1109_v44 = vadd.f32 1.0, %v2414_v41 }
 0x636   :  { %2415 = vrcp.f32 %v1099_v40 }
 0x637   :  { %2417 = vrcp.f32 %v1109_v44 }
 0x640   :  { %v2416_v48 = vpop.eup %2415 }
 0x641   :  { %v1112_v49 = vmul.f32 %v2416_v48, %v1092_v45  ;;  %v2418_v54 = vpop.eup %2417 }
 0x642   :  { %v1117_v55 = vsub.f32 1.0, %v2418_v54  ;;  %v1119_v59 = vmul.f32 %v2418_v54, %v2851_v19 }
 0x643   :  { %v1115_v53 = vadd.f32 %v1113_v46, %v1112_v49 }
 0x645   :  { %2419 = vtanh.f32 %v1115_v53 }
 0x64f   :  { %v2420_v57 = vpop.eup %2419 }
 0x650   :  { %v1118_v58 = vmul.f32 %v2420_v57, %v1117_v55 }
 0x652   :  { %v2901_v62 = vadd.f32 %v1119_v59, %v1118_v58 }
 0x654   :  { %1121 = vst [vmem:[%s2965_s4 + $0x5] sm:$0x1] %v2901_v62  ;;  %1189 = vmatmul.mubr.f32.vlgmr.msra.gmra.mrb[12].mxu0 %v2901_v62  ;;  %1870 = vmatmul.mubr.f32.vlgmr.msra.gmra.mrb[12].mxu1 %v2901_v62 }
 0x655   :  { %2302 = vmatpush1.bf16.msra.mxu0 %v2514_v9  ;;  %2333 = vmatpush3.bf16.msra.mxu1 %v2531_v29 }
 0x656   :  { %2304 = vmatprep.subr.bf16.mxu0 %v2516_v10  ;;  %2334 = vmatprep.subr.bf16.mxu1 %v2468_v0 }
 0x657   :  { %1358 = vmatprep.mubr.f32.mxu0 %v2469_v1  ;;  %1904 = vmatprep.mubr.msk.f32.mxu1 %vm2470_vm0, %v2469_v1  ;;  %v1485_v1 = vld [vmem:[%s2961_s0 + $0x6] ss:$8 sm:$0x7] }
 0x658   :  { %v1273_v29 = vrot.slane %v1485_v1, 1 }
 0x659   :  { %2306 = vmatpush1.bf16.msra.mxu0 %v2520_v15  ;;  %2336 = vmatpush3.bf16.msra.mxu1 %v2543_v38 }
 0x65a   :  { %2308 = vmatprep.subr.bf16.mxu0 %v2523_v16  ;;  %2337 = vmatprep.subr.bf16.mxu1 %v2468_v0 }
 0x65d   :  { %2310 = vmatpush1.bf16.msra.mxu0 %v2526_v21  ;;  %2339 = vmatpush3.bf16.msra.mxu1 %v2553_v47 }
 0x65e   :  { %2312 = vmatprep.subr.bf16.mxu0 %v2529_v22  ;;  %2340 = vmatprep.subr.bf16.mxu1 %v2468_v0 }
 0x661   :  { %2314 = vmatpush1.bf16.msra.mxu0 %v2537_v32  ;;  %2342 = vmatpush3.bf16.msra.mxu1 %v2563_v56  ;;  %v1283_v56 = vrot.slane %v1485_v1, 2 }
 0x662   :  { %2316 = vmatprep.subr.bf16.mxu0 %v2540_v34  ;;  %2343 = vmatprep.subr.bf16.mxu1 %v2468_v0 }
 0x665   :  { %2318 = vmatpush1.bf16.msra.mxu0 %v2547_v42  ;;  %2345 = vmatpush3.bf16.msra.mxu1 %v2573_v2 }
 0x666   :  { %2320 = vmatprep.subr.bf16.mxu0 %v2550_v43  ;;  %2346 = vmatprep.subr.bf16.mxu1 %v2468_v0 }
 0x669   :  { %2322 = vmatpush1.bf16.msra.mxu0 %v2557_v51  ;;  %2348 = vmatpush3.bf16.msra.mxu1 %v2581_v7 }
 0x66a   :  { %2324 = vmatprep.subr.bf16.mxu0 %v2560_v52  ;;  %2349 = vmatprep.subr.bf16.mxu1 %v2468_v0 }
 0x66d   :  { %2326 = vmatpush1.bf16.msra.mxu0 %v2567_v60  ;;  %2351 = vmatpush3.bf16.msra.mxu1 %v2588_v13 }
 0x66e   :  { %2328 = vmatprep.subr.bf16.mxu0 %v2570_v61  ;;  %2352 = vmatprep.subr.bf16.mxu1 %v2468_v0 }
 0x671   :  { %2330 = vmatpush1.bf16.msra.mxu0 %v2577_v6  ;;  %2354 = vmatpush3.bf16.msra.mxu1 %v2596_v18 }
 0x727   :  { %v1190_v9 = vpop.f32.mrb[12].mxu0  ;;  %v1261_v10 = vpop.f32.mrb[12].mxu1 }
 0x728   :  { %v1191_v15 = vadd.f32 %v1190_v9, %v2638_v26  ;;  %v1192_v16 = vpop.f32.mrb[13].mxu0  ;;  %v1871_v21 = vpop.f32.mrb[13].mxu1  ;;  %v1262_v52 = vadd.f32 %v1261_v10, %v2647_v50 }
 0x729   :  { %v1193_v22 = vadd.f32 %v1192_v16, %v2640_v27 }
 0x72a   :  { %v1265_v32 = vadd.f32 %v1485_v1, %v1191_v15 }
 0x72b   :  { %v1275_v0 = vadd.f32 %v1273_v29, %v1193_v22 }
 0x72c   :  { %v1486_v34 = vmul.f32 -1.442695, %v1265_v32 }
 0x72d   :  { %v1487_v38 = vmul.f32 -1.442695, %v1275_v0 }
 0x72e   :  { %2421 = vpow2.f32 %v1486_v34 }
 0x72f   :  { %2423 = vpow2.f32 %v1487_v38 }
 0x738   :  { %v2422_v42 = vpop.eup %2421 }
 0x739   :  { %v1269_v43 = vadd.f32 1.0, %v2422_v42  ;;  %v2424_v47 = vpop.eup %2423 }
 0x73a   :  { %v1279_v51 = vadd.f32 1.0, %v2424_v47 }
 0x73b   :  { %2425 = vrcp.f32 %v1269_v43 }
 0x73c   :  { %2427 = vrcp.f32 %v1279_v51 }
 0x745   :  { %v2426_v60 = vpop.eup %2425 }
 0x746   :  { %v1282_v61 = vmul.f32 %v2426_v60, %v1262_v52  ;;  %v2428_v6 = vpop.eup %2427 }
 0x747   :  { %v1287_v7 = vsub.f32 1.0, %v2428_v6  ;;  %v1289_v63 = vmul.f32 %v2428_v6, %v2901_v62 }
 0x748   :  { %v1285_v2 = vadd.f32 %v1283_v56, %v1282_v61 }
 0x74a   :  { %2429 = vtanh.f32 %v1285_v2 }
 0x754   :  { %v2430_v13 = vpop.eup %2429 }
 0x755   :  { %v1288_v18 = vmul.f32 %v2430_v13, %v1287_v7 }
 0x757   :  { %v1290_v3 = vadd.f32 %v1289_v63, %v1288_v18 }
 0x759   :  { %1291 = vst [vmem:[%s2965_s4 + $0x6] sm:$0x1] %v1290_v3  ;;  %1359 = vmatmul.mubr.f32.vlgmr.msra.gmra.mrb[14].mxu0 %v1290_v3  ;;  %1905 = vmatmul.mubr.f32.vlgmr.msra.gmra.mrb[14].mxu1 %v1290_v3 }
 0x82c   :  { %v1360_v8 = vpop.f32.mrb[14].mxu0  ;;  %v1431_v11 = vpop.f32.mrb[14].mxu1 }
 0x82d   :  { %v1361_v14 = vadd.f32 %v1360_v8, %v2638_v26  ;;  %v1362_v12 = vpop.f32.mrb[15].mxu0  ;;  %v1906_v17 = vpop.f32.mrb[15].mxu1  ;;  %v1432_v36 = vadd.f32 %v1431_v11, %v2647_v50 }
 0x82e   :  { %v1363_v19 = vadd.f32 %v1362_v12, %v2640_v27 }
 0x82f   :  { %v1435_v23 = vadd.f32 %v1488_v4, %v1361_v14 }
 0x830   :  { %v1445_v25 = vadd.f32 %v1443_v20, %v1363_v19 }
 0x831   :  { %v1489_v24 = vmul.f32 -1.442695, %v1435_v23 }
 0x832   :  { %v1490_v28 = vmul.f32 -1.442695, %v1445_v25 }
 0x833   :  { %2431 = vpow2.f32 %v1489_v24 }
 0x834   :  { %2433 = vpow2.f32 %v1490_v28 }
 0x83d   :  { %v2432_v30 = vpop.eup %2431 }
 0x83e   :  { %v1439_v31 = vadd.f32 1.0, %v2432_v30  ;;  %v2434_v33 = vpop.eup %2433 }
 0x83f   :  { %v1449_v35 = vadd.f32 1.0, %v2434_v33 }
 0x840   :  { %2435 = vrcp.f32 %v1439_v31 }
 0x841   :  { %2437 = vrcp.f32 %v1449_v35 }
 0x84a   :  { %v2436_v26 = vpop.eup %2435 }
 0x84b   :  { %v1452_v5 = vmul.f32 %v2436_v26, %v1432_v36  ;;  %v2438_v27 = vpop.eup %2437 }
 0x84c   :  { %v1457_v40 = vsub.f32 1.0, %v2438_v27  ;;  %v1459_v45 = vmul.f32 %v2438_v27, %v1290_v3 }
 0x84d   :  { %v1455_v39 = vadd.f32 %v1453_v37, %v1452_v5 }
 0x84f   :  { %2439 = vtanh.f32 %v1455_v39 }
 0x859   :  { %v2440_v41 = vpop.eup %2439 }
 0x85a   :  { %v1458_v44 = vmul.f32 %v2440_v41, %v1457_v40 }
 0x85c   :  { %v1460_v46 = vadd.f32 %v1459_v45, %v1458_v44 }
 0x85e   :  { %1461 = vst [vmem:[%s2965_s4 + $0x7] sm:$0x1] %v1460_v46  ;;  %1462 = vst [vmem:[#allocation2] sm:$0x1] %v1460_v46 }
 0x85f   :  { %1467 = vsyncpa [#allocation4], 1 }

</bundles_post_ra>
